<compile_context>
chip_gen: v7x
topology: tpu7x:2x2x1
jax: 0.10.0
libtpu: 0.0.40
codegen_flags: <defaults>
</compile_context>

<pallas_src>
import jax
import jax.numpy as jnp
import numpy as np
from jax import lax
from jax.experimental import pallas as pl
from jax.experimental.pallas import tpu as pltpu  # noqa: F401  (TPU backend / tuning hooks)

# ---------------- configuration (small, consistent with the module) ----------------
N, C_IN, H, W = 2, 16, 16, 16          # input x: (N, C_IN, H, W)  NCHW
C_OUT = 32                             # out_planes (>= 16 so the CA bottleneck is non-empty)
C_HID = C_OUT // 16                    # hidden channels of the ChannelAttention bottleneck
KH = KW = 3
STRIDE, PAD = 1, 1                     # flat-tap conv below assumes STRIDE == 1
EPS = 1e-5                             # nn.BatchNorm2d default eps

H_OUT = (H + 2 * PAD - KH) // STRIDE + 1
W_OUT = (W + 2 * PAD - KW) // STRIDE + 1
W_PAD = W + 2 * PAD                    # 18: padded width (kept in the flat layout)
H_PADX = H + 2 * PAD + 1               # 19: one extra zero row so all tap slices stay in-bounds
L_IN = H_PADX * W_PAD                  # 342: flattened padded plane length per (n, c)
L_OUT = H_OUT * W_PAD                  # 288: flat (padded-width) output length per image
HW = H_OUT * W_OUT                     # 256: valid output positions per image
N_TAPS = KH * KW

# static validity mask over the flat output: p = i*W_PAD + j is a real pixel iff j < W_OUT
_MASK = jnp.asarray((np.arange(L_OUT) % W_PAD < W_OUT).astype(np.float32).reshape(1, L_OUT))


# -------- fused kernel: conv (im2col-free) + BN(batch stats) + CA + gate + ReLU --------
def fused_kernel(x_ref, w_ref, p_ref, mask_ref, o_ref):
    # x_ref:    (N, C_IN, L_IN)   zero-padded planes, flattened (H_pad, W_pad), channel-major
    # w_ref:    (N_TAPS, C_OUT, C_IN) conv weight, tap-major ((kh,kw) flattened)
    # p_ref:    (C_OUT, 2 + 2*C_HID) packed [gamma | beta | fc1^T | fc2]
    # mask_ref: (1, L_OUT) f32, 1.0 at real output pixels, 0.0 at padded-width garbage
    # o_ref:    (N, C_OUT, L_OUT)
    maskf = mask_ref[...]
    maskb = maskf > 0.5
    gamma = p_ref[:, 0:1]
    beta = p_ref[:, 1:2]
    w1t = p_ref[:, 2:2 + C_HID]                    # fc1.weight^T  (C_OUT, C_HID)
    w2 = p_ref[:, 2 + C_HID:2 + 2 * C_HID]         # fc2.weight    (C_OUT, C_HID)

    # ---- conv: 9 tap-shifted matmuls per image; every tap is a contiguous lane slice ----
    ys = []        # per-image conv output in the flat padded-width layout, (C_OUT, L_OUT)
    s = []         # per-image masked channel sums (reused for BN mean AND the avg-pool)
    for n in range(N):
        acc = None
        for dh in range(KH):
            for dw in range(KW):
                t = dh * W_PAD + dw
                patch = x_ref[n, :, t:t + L_OUT]                       # (C_IN, L_OUT)
                part = jnp.dot(w_ref[dh * KW + dw], patch,
                               preferred_element_type=jnp.float32)     # (C_OUT, L_OUT)
                acc = part if acc is None else acc + part
        ys.append(acc)
        s.append(jnp.sum(acc * maskf, axis=1, keepdims=True))          # (C_OUT, 1)

    # ---- BatchNorm2d training-mode batch stats over all valid (N, H, W) positions ----
    inv_cnt = 1.0 / (N * HW)
    mean = (s[0] + s[1]) * inv_cnt                                     # (C_OUT, 1)
    d0 = (ys[0] - mean) * maskf
    d1 = (ys[1] - mean) * maskf
    var = (jnp.sum(d0 * d0, axis=1, keepdims=True)
           + jnp.sum(d1 * d1, axis=1, keepdims=True)) * inv_cnt        # biased, (C_OUT, 1)
    scale = gamma * lax.rsqrt(var + EPS)
    bias = beta - mean * scale

    # ---- per-image BN apply + adaptive avg / max pooling ----
    bns = []
    pools = []                                                         # [avg0, max0, avg1, max1]
    for n in range(N):
        bn_n = ys[n] * scale + bias                                    # (C_OUT, L_OUT)
        bns.append(bn_n)
        avg_n = scale * (s[n] * (1.0 / HW)) + bias                     # avg-pool folded thru affine
        mx_n = jnp.max(jnp.where(maskb, bn_n, -jnp.inf),
                       axis=1, keepdims=True)                          # masked max-pool
        pools += [avg_n, mx_n]

    # ---- batched ChannelAttention: one fc1 -> ReLU -> fc2 over the 2*N pooled columns ----
    ncol = 2 * N
    pmat = jnp.concatenate(pools, axis=1)                              # (C_OUT, 2*N)
    prod = jnp.concatenate([w1t[:, j:j + 1] * pmat for j in range(C_HID)],
                           axis=1)                                     # (C_OUT, 2*N*C_HID)
    h = jnp.maximum(jnp.sum(prod, axis=0, keepdims=True), 0.0)         # (1, 2*N*C_HID)
    logits = None
    for j in range(C_HID):
        contrib = w2[:, j:j + 1] * h[:, j * ncol:(j + 1) * ncol]       # (C_OUT, 2*N)
        logits = contrib if logits is None else logits + contrib

    # ---- gate + ReLU, stored lane-dense per image ----
    for n in range(N):
        att = jax.nn.sigmoid(logits[:, 2 * n:2 * n + 1]
                             + logits[:, 2 * n + 1:2 * n + 2])         # (C_OUT, 1)
        o_ref[n] = jnp.maximum(bns[n] * att, 0.0)


# ---------------- wrapper ----------------
@jax.jit
def basic_block_sem(x_nchw, w_conv, gamma, beta, w_fc1, w_fc2):
    # Pad H by (1, 2) and W by (1, 1): the extra bottom zero-row keeps every tap's flat
    # lane-slice [t, t+L_OUT) in-bounds; then flatten each padded plane onto the lane axis.
    xp = jnp.pad(x_nchw.astype(jnp.float32),
                 ((0, 0), (0, 0), (PAD, PAD + 1), (PAD, PAD)))         # (N, C_IN, 19, 18)
    xf = xp.reshape(N, C_IN, L_IN)                                     # (N, C_IN, 342)

    # conv weight, tap-major: (N_TAPS, C_OUT, C_IN)
    wt = jnp.transpose(w_conv.astype(jnp.float32), (2, 3, 0, 1)).reshape(N_TAPS, C_OUT, C_IN)

    # pack the tiny per-channel params into one (C_OUT, 2 + 2*C_HID) slab -> single DMA
    params = jnp.concatenate(
        [gamma.reshape(C_OUT, 1), beta.reshape(C_OUT, 1),
         jnp.transpose(w_fc1), w_fc2], axis=1).astype(jnp.float32)     # (C_OUT, 6)

    of = pl.pallas_call(
        fused_kernel,
        out_shape=jax.ShapeDtypeStruct((N, C_OUT, L_OUT), jnp.float32),
    )(xf, wt, params, _MASK)

    # drop the two padded-width garbage columns per row -> NCHW directly (no transpose)
    return of.reshape(N, C_OUT, H_OUT, W_PAD)[:, :, :, :W_OUT]
    # TODO(synk): optional bf16 cast of xf/wt for v5e bandwidth; kept f32 to hold 2e-3 tolerance.


# ---------------- pure-JAX reference (mirrors the PyTorch forward) ----------------
def reference(x_nchw, w_conv, gamma, beta, w_fc1, w_fc2):
    y = jax.lax.conv_general_dilated(
        x_nchw, w_conv, (STRIDE, STRIDE), [(PAD, PAD), (PAD, PAD)],
        dimension_numbers=("NCHW", "OIHW", "NCHW"),
        precision=jax.lax.Precision.HIGHEST)
    mean = jnp.mean(y, axis=(0, 2, 3), keepdims=True)
    var = jnp.mean((y - mean) ** 2, axis=(0, 2, 3), keepdims=True)
    bn = (y - mean) / jnp.sqrt(var + EPS) * gamma[None, :, None, None] + beta[None, :, None, None]
    avgp = jnp.mean(bn, axis=(2, 3), keepdims=True)
    maxp = jnp.max(bn, axis=(2, 3), keepdims=True)

    def fc(p):
        h = jnp.maximum(jnp.einsum("oc,ncij->noij", w_fc1, p), 0.0)
        return jnp.einsum("oc,ncij->noij", w_fc2, h)

    ca = jax.nn.sigmoid(fc(avgp) + fc(maxp))
    return jnp.maximum(ca * bn, 0.0)


if __name__ == "__main__":
    key = jax.random.PRNGKey(0)
    k1, k2, k3, k4 = jax.random.split(key, 4)

    x = jax.random.normal(k1, (N, C_IN, H, W), jnp.float32)
    w_conv = jax.random.normal(k2, (C_OUT, C_IN, KH, KW), jnp.float32) * 0.1
    gamma = jnp.ones((C_OUT,), jnp.float32)    # nn.BatchNorm2d default weight
    beta = jnp.zeros((C_OUT,), jnp.float32)    # nn.BatchNorm2d default bias
    w_fc1 = jax.random.normal(k3, (C_HID, C_OUT), jnp.float32) * 0.1   # CA fc1 (1x1 conv, no bias)
    w_fc2 = jax.random.normal(k4, (C_OUT, C_HID), jnp.float32) * 0.1   # CA fc2 (1x1 conv, no bias)

    out = jax.block_until_ready(basic_block_sem(x, w_conv, gamma, beta, w_fc1, w_fc2))

    ref = reference(x, w_conv, gamma, beta, w_fc1, w_fc2)
    np.testing.assert_allclose(np.asarray(out), np.asarray(ref), rtol=2e-3, atol=2e-3)
    print("KERNEL_OK")
</pallas_src>

<mosaic_0001>
module attributes {stable_mosaic.version = 11 : i64} {
  func.func @fused_kernel(%arg0: memref<2x16x342xf32, #tpu.memory_space<vmem>>, %arg1: memref<9x32x16xf32, #tpu.memory_space<vmem>>, %arg2: memref<32x6xf32, #tpu.memory_space<vmem>>, %arg3: memref<1x288xf32, #tpu.memory_space<vmem>>, %arg4: memref<2x32x288xf32, #tpu.memory_space<vmem>>) attributes {dimension_semantics = [], scalar_prefetch = 0 : i64, scratch_operands = 0 : i64, tpu.core_type = #tpu.core_type<tc>} {
    %c0 = arith.constant 0 : index
    %c0_0 = arith.constant 0 : index
    %0 = vector.load %arg3[%c0, %c0_0] : memref<1x288xf32, #tpu.memory_space<vmem>>, vector<1x288xf32>
    %cst = arith.constant 5.000000e-01 : f32
    %1 = vector.broadcast %cst : f32 to vector<1x288xf32>
    %2 = arith.cmpf ogt, %0, %1 : vector<1x288xf32>
    %c0_1 = arith.constant 0 : index
    %c0_2 = arith.constant 0 : index
    %3 = vector.load %arg2[%c0_1, %c0_2] : memref<32x6xf32, #tpu.memory_space<vmem>>, vector<32x1xf32>
    %c0_3 = arith.constant 0 : index
    %c1 = arith.constant 1 : index
    %4 = vector.load %arg2[%c0_3, %c1] : memref<32x6xf32, #tpu.memory_space<vmem>>, vector<32x1xf32>
    %c0_4 = arith.constant 0 : index
    %c2 = arith.constant 2 : index
    %5 = vector.load %arg2[%c0_4, %c2] : memref<32x6xf32, #tpu.memory_space<vmem>>, vector<32x2xf32>
    %c0_5 = arith.constant 0 : index
    %c4 = arith.constant 4 : index
    %6 = vector.load %arg2[%c0_5, %c4] : memref<32x6xf32, #tpu.memory_space<vmem>>, vector<32x2xf32>
    %c0_6 = arith.constant 0 : index
    %c0_7 = arith.constant 0 : index
    %c0_8 = arith.constant 0 : index
    %7 = vector.load %arg0[%c0_6, %c0_7, %c0_8] : memref<2x16x342xf32, #tpu.memory_space<vmem>>, vector<1x16x288xf32>
    %8 = vector.shape_cast %7 : vector<1x16x288xf32> to vector<16x288xf32>
    %c0_9 = arith.constant 0 : index
    %c0_10 = arith.constant 0 : index
    %c0_11 = arith.constant 0 : index
    %9 = vector.load %arg1[%c0_9, %c0_10, %c0_11] : memref<9x32x16xf32, #tpu.memory_space<vmem>>, vector<1x32x16xf32>
    %10 = vector.shape_cast %9 : vector<1x32x16xf32> to vector<32x16xf32>
    %cst_12 = arith.constant dense<0.000000e+00> : vector<32x288xf32>
    %11 = tpu.matmul %10, %8, %cst_12 {dimension_numbers = #tpu.dot_dimension_numbers<[1], [0], [0], [1], [0, 0, 1, 1], [], []>} : vector<32x16xf32>, vector<16x288xf32>, vector<32x288xf32> -> vector<32x288xf32>
    %c0_13 = arith.constant 0 : index
    %c0_14 = arith.constant 0 : index
    %c1_15 = arith.constant 1 : index
    %12 = vector.load %arg0[%c0_13, %c0_14, %c1_15] : memref<2x16x342xf32, #tpu.memory_space<vmem>>, vector<1x16x288xf32>
    %13 = vector.shape_cast %12 : vector<1x16x288xf32> to vector<16x288xf32>
    %c1_16 = arith.constant 1 : index
    %c0_17 = arith.constant 0 : index
    %c0_18 = arith.constant 0 : index
    %14 = vector.load %arg1[%c1_16, %c0_17, %c0_18] : memref<9x32x16xf32, #tpu.memory_space<vmem>>, vector<1x32x16xf32>
    %15 = vector.shape_cast %14 : vector<1x32x16xf32> to vector<32x16xf32>
    %cst_19 = arith.constant dense<0.000000e+00> : vector<32x288xf32>
    %16 = tpu.matmul %15, %13, %cst_19 {dimension_numbers = #tpu.dot_dimension_numbers<[1], [0], [0], [1], [0, 0, 1, 1], [], []>} : vector<32x16xf32>, vector<16x288xf32>, vector<32x288xf32> -> vector<32x288xf32>
    %17 = arith.addf %11, %16 : vector<32x288xf32>
    %c0_20 = arith.constant 0 : index
    %c0_21 = arith.constant 0 : index
    %c2_22 = arith.constant 2 : index
    %18 = vector.load %arg0[%c0_20, %c0_21, %c2_22] : memref<2x16x342xf32, #tpu.memory_space<vmem>>, vector<1x16x288xf32>
    %19 = vector.shape_cast %18 : vector<1x16x288xf32> to vector<16x288xf32>
    %c2_23 = arith.constant 2 : index
    %c0_24 = arith.constant 0 : index
    %c0_25 = arith.constant 0 : index
    %20 = vector.load %arg1[%c2_23, %c0_24, %c0_25] : memref<9x32x16xf32, #tpu.memory_space<vmem>>, vector<1x32x16xf32>
    %21 = vector.shape_cast %20 : vector<1x32x16xf32> to vector<32x16xf32>
    %cst_26 = arith.constant dense<0.000000e+00> : vector<32x288xf32>
    %22 = tpu.matmul %21, %19, %cst_26 {dimension_numbers = #tpu.dot_dimension_numbers<[1], [0], [0], [1], [0, 0, 1, 1], [], []>} : vector<32x16xf32>, vector<16x288xf32>, vector<32x288xf32> -> vector<32x288xf32>
    %23 = arith.addf %17, %22 : vector<32x288xf32>
    %c0_27 = arith.constant 0 : index
    %c0_28 = arith.constant 0 : index
    %c18 = arith.constant 18 : index
    %24 = vector.load %arg0[%c0_27, %c0_28, %c18] : memref<2x16x342xf32, #tpu.memory_space<vmem>>, vector<1x16x288xf32>
    %25 = vector.shape_cast %24 : vector<1x16x288xf32> to vector<16x288xf32>
    %c3 = arith.constant 3 : index
    %c0_29 = arith.constant 0 : index
    %c0_30 = arith.constant 0 : index
    %26 = vector.load %arg1[%c3, %c0_29, %c0_30] : memref<9x32x16xf32, #tpu.memory_space<vmem>>, vector<1x32x16xf32>
    %27 = vector.shape_cast %26 : vector<1x32x16xf32> to vector<32x16xf32>
    %cst_31 = arith.constant dense<0.000000e+00> : vector<32x288xf32>
    %28 = tpu.matmul %27, %25, %cst_31 {dimension_numbers = #tpu.dot_dimension_numbers<[1], [0], [0], [1], [0, 0, 1, 1], [], []>} : vector<32x16xf32>, vector<16x288xf32>, vector<32x288xf32> -> vector<32x288xf32>
    %29 = arith.addf %23, %28 : vector<32x288xf32>
    %c0_32 = arith.constant 0 : index
    %c0_33 = arith.constant 0 : index
    %c19 = arith.constant 19 : index
    %30 = vector.load %arg0[%c0_32, %c0_33, %c19] : memref<2x16x342xf32, #tpu.memory_space<vmem>>, vector<1x16x288xf32>
    %31 = vector.shape_cast %30 : vector<1x16x288xf32> to vector<16x288xf32>
    %c4_34 = arith.constant 4 : index
    %c0_35 = arith.constant 0 : index
    %c0_36 = arith.constant 0 : index
    %32 = vector.load %arg1[%c4_34, %c0_35, %c0_36] : memref<9x32x16xf32, #tpu.memory_space<vmem>>, vector<1x32x16xf32>
    %33 = vector.shape_cast %32 : vector<1x32x16xf32> to vector<32x16xf32>
    %cst_37 = arith.constant dense<0.000000e+00> : vector<32x288xf32>
    %34 = tpu.matmul %33, %31, %cst_37 {dimension_numbers = #tpu.dot_dimension_numbers<[1], [0], [0], [1], [0, 0, 1, 1], [], []>} : vector<32x16xf32>, vector<16x288xf32>, vector<32x288xf32> -> vector<32x288xf32>
    %35 = arith.addf %29, %34 : vector<32x288xf32>
    %c0_38 = arith.constant 0 : index
    %c0_39 = arith.constant 0 : index
    %c20 = arith.constant 20 : index
    %36 = vector.load %arg0[%c0_38, %c0_39, %c20] : memref<2x16x342xf32, #tpu.memory_space<vmem>>, vector<1x16x288xf32>
    %37 = vector.shape_cast %36 : vector<1x16x288xf32> to vector<16x288xf32>
    %c5 = arith.constant 5 : index
    %c0_40 = arith.constant 0 : index
    %c0_41 = arith.constant 0 : index
    %38 = vector.load %arg1[%c5, %c0_40, %c0_41] : memref<9x32x16xf32, #tpu.memory_space<vmem>>, vector<1x32x16xf32>
    %39 = vector.shape_cast %38 : vector<1x32x16xf32> to vector<32x16xf32>
    %cst_42 = arith.constant dense<0.000000e+00> : vector<32x288xf32>
    %40 = tpu.matmul %39, %37, %cst_42 {dimension_numbers = #tpu.dot_dimension_numbers<[1], [0], [0], [1], [0, 0, 1, 1], [], []>} : vector<32x16xf32>, vector<16x288xf32>, vector<32x288xf32> -> vector<32x288xf32>
    %41 = arith.addf %35, %40 : vector<32x288xf32>
    %c0_43 = arith.constant 0 : index
    %c0_44 = arith.constant 0 : index
    %c36 = arith.constant 36 : index
    %42 = vector.load %arg0[%c0_43, %c0_44, %c36] : memref<2x16x342xf32, #tpu.memory_space<vmem>>, vector<1x16x288xf32>
    %43 = vector.shape_cast %42 : vector<1x16x288xf32> to vector<16x288xf32>
    %c6 = arith.constant 6 : index
    %c0_45 = arith.constant 0 : index
    %c0_46 = arith.constant 0 : index
    %44 = vector.load %arg1[%c6, %c0_45, %c0_46] : memref<9x32x16xf32, #tpu.memory_space<vmem>>, vector<1x32x16xf32>
    %45 = vector.shape_cast %44 : vector<1x32x16xf32> to vector<32x16xf32>
    %cst_47 = arith.constant dense<0.000000e+00> : vector<32x288xf32>
    %46 = tpu.matmul %45, %43, %cst_47 {dimension_numbers = #tpu.dot_dimension_numbers<[1], [0], [0], [1], [0, 0, 1, 1], [], []>} : vector<32x16xf32>, vector<16x288xf32>, vector<32x288xf32> -> vector<32x288xf32>
    %47 = arith.addf %41, %46 : vector<32x288xf32>
    %c0_48 = arith.constant 0 : index
    %c0_49 = arith.constant 0 : index
    %c37 = arith.constant 37 : index
    %48 = vector.load %arg0[%c0_48, %c0_49, %c37] : memref<2x16x342xf32, #tpu.memory_space<vmem>>, vector<1x16x288xf32>
    %49 = vector.shape_cast %48 : vector<1x16x288xf32> to vector<16x288xf32>
    %c7 = arith.constant 7 : index
    %c0_50 = arith.constant 0 : index
    %c0_51 = arith.constant 0 : index
    %50 = vector.load %arg1[%c7, %c0_50, %c0_51] : memref<9x32x16xf32, #tpu.memory_space<vmem>>, vector<1x32x16xf32>
    %51 = vector.shape_cast %50 : vector<1x32x16xf32> to vector<32x16xf32>
    %cst_52 = arith.constant dense<0.000000e+00> : vector<32x288xf32>
    %52 = tpu.matmul %51, %49, %cst_52 {dimension_numbers = #tpu.dot_dimension_numbers<[1], [0], [0], [1], [0, 0, 1, 1], [], []>} : vector<32x16xf32>, vector<16x288xf32>, vector<32x288xf32> -> vector<32x288xf32>
    %53 = arith.addf %47, %52 : vector<32x288xf32>
    %c0_53 = arith.constant 0 : index
    %c0_54 = arith.constant 0 : index
    %c38 = arith.constant 38 : index
    %54 = vector.load %arg0[%c0_53, %c0_54, %c38] : memref<2x16x342xf32, #tpu.memory_space<vmem>>, vector<1x16x288xf32>
    %55 = vector.shape_cast %54 : vector<1x16x288xf32> to vector<16x288xf32>
    %c8 = arith.constant 8 : index
    %c0_55 = arith.constant 0 : index
    %c0_56 = arith.constant 0 : index
    %56 = vector.load %arg1[%c8, %c0_55, %c0_56] : memref<9x32x16xf32, #tpu.memory_space<vmem>>, vector<1x32x16xf32>
    %57 = vector.shape_cast %56 : vector<1x32x16xf32> to vector<32x16xf32>
    %cst_57 = arith.constant dense<0.000000e+00> : vector<32x288xf32>
    %58 = tpu.matmul %57, %55, %cst_57 {dimension_numbers = #tpu.dot_dimension_numbers<[1], [0], [0], [1], [0, 0, 1, 1], [], []>} : vector<32x16xf32>, vector<16x288xf32>, vector<32x288xf32> -> vector<32x288xf32>
    %59 = arith.addf %53, %58 : vector<32x288xf32>
    %60 = vector.broadcast %0 : vector<1x288xf32> to vector<32x288xf32>
    %61 = arith.mulf %59, %60 : vector<32x288xf32>
    %cst_58 = arith.constant dense<0.000000e+00> : vector<32xf32>
    %62 = vector.multi_reduction <add>, %61, %cst_58 [1] : vector<32x288xf32> to vector<32xf32>
    %63 = vector.shape_cast %62 : vector<32xf32> to vector<32x1xf32>
    %c1_59 = arith.constant 1 : index
    %c0_60 = arith.constant 0 : index
    %c0_61 = arith.constant 0 : index
    %64 = vector.load %arg0[%c1_59, %c0_60, %c0_61] : memref<2x16x342xf32, #tpu.memory_space<vmem>>, vector<1x16x288xf32>
    %65 = vector.shape_cast %64 : vector<1x16x288xf32> to vector<16x288xf32>
    %c0_62 = arith.constant 0 : index
    %c0_63 = arith.constant 0 : index
    %c0_64 = arith.constant 0 : index
    %66 = vector.load %arg1[%c0_62, %c0_63, %c0_64] : memref<9x32x16xf32, #tpu.memory_space<vmem>>, vector<1x32x16xf32>
    %67 = vector.shape_cast %66 : vector<1x32x16xf32> to vector<32x16xf32>
    %cst_65 = arith.constant dense<0.000000e+00> : vector<32x288xf32>
    %68 = tpu.matmul %67, %65, %cst_65 {dimension_numbers = #tpu.dot_dimension_numbers<[1], [0], [0], [1], [0, 0, 1, 1], [], []>} : vector<32x16xf32>, vector<16x288xf32>, vector<32x288xf32> -> vector<32x288xf32>
    %c1_66 = arith.constant 1 : index
    %c0_67 = arith.constant 0 : index
    %c1_68 = arith.constant 1 : index
    %69 = vector.load %arg0[%c1_66, %c0_67, %c1_68] : memref<2x16x342xf32, #tpu.memory_space<vmem>>, vector<1x16x288xf32>
    %70 = vector.shape_cast %69 : vector<1x16x288xf32> to vector<16x288xf32>
    %c1_69 = arith.constant 1 : index
    %c0_70 = arith.constant 0 : index
    %c0_71 = arith.constant 0 : index
    %71 = vector.load %arg1[%c1_69, %c0_70, %c0_71] : memref<9x32x16xf32, #tpu.memory_space<vmem>>, vector<1x32x16xf32>
    %72 = vector.shape_cast %71 : vector<1x32x16xf32> to vector<32x16xf32>
    %cst_72 = arith.constant dense<0.000000e+00> : vector<32x288xf32>
    %73 = tpu.matmul %72, %70, %cst_72 {dimension_numbers = #tpu.dot_dimension_numbers<[1], [0], [0], [1], [0, 0, 1, 1], [], []>} : vector<32x16xf32>, vector<16x288xf32>, vector<32x288xf32> -> vector<32x288xf32>
    %74 = arith.addf %68, %73 : vector<32x288xf32>
    %c1_73 = arith.constant 1 : index
    %c0_74 = arith.constant 0 : index
    %c2_75 = arith.constant 2 : index
    %75 = vector.load %arg0[%c1_73, %c0_74, %c2_75] : memref<2x16x342xf32, #tpu.memory_space<vmem>>, vector<1x16x288xf32>
    %76 = vector.shape_cast %75 : vector<1x16x288xf32> to vector<16x288xf32>
    %c2_76 = arith.constant 2 : index
    %c0_77 = arith.constant 0 : index
    %c0_78 = arith.constant 0 : index
    %77 = vector.load %arg1[%c2_76, %c0_77, %c0_78] : memref<9x32x16xf32, #tpu.memory_space<vmem>>, vector<1x32x16xf32>
    %78 = vector.shape_cast %77 : vector<1x32x16xf32> to vector<32x16xf32>
    %cst_79 = arith.constant dense<0.000000e+00> : vector<32x288xf32>
    %79 = tpu.matmul %78, %76, %cst_79 {dimension_numbers = #tpu.dot_dimension_numbers<[1], [0], [0], [1], [0, 0, 1, 1], [], []>} : vector<32x16xf32>, vector<16x288xf32>, vector<32x288xf32> -> vector<32x288xf32>
    %80 = arith.addf %74, %79 : vector<32x288xf32>
    %c1_80 = arith.constant 1 : index
    %c0_81 = arith.constant 0 : index
    %c18_82 = arith.constant 18 : index
    %81 = vector.load %arg0[%c1_80, %c0_81, %c18_82] : memref<2x16x342xf32, #tpu.memory_space<vmem>>, vector<1x16x288xf32>
    %82 = vector.shape_cast %81 : vector<1x16x288xf32> to vector<16x288xf32>
    %c3_83 = arith.constant 3 : index
    %c0_84 = arith.constant 0 : index
    %c0_85 = arith.constant 0 : index
    %83 = vector.load %arg1[%c3_83, %c0_84, %c0_85] : memref<9x32x16xf32, #tpu.memory_space<vmem>>, vector<1x32x16xf32>
    %84 = vector.shape_cast %83 : vector<1x32x16xf32> to vector<32x16xf32>
    %cst_86 = arith.constant dense<0.000000e+00> : vector<32x288xf32>
    %85 = tpu.matmul %84, %82, %cst_86 {dimension_numbers = #tpu.dot_dimension_numbers<[1], [0], [0], [1], [0, 0, 1, 1], [], []>} : vector<32x16xf32>, vector<16x288xf32>, vector<32x288xf32> -> vector<32x288xf32>
    %86 = arith.addf %80, %85 : vector<32x288xf32>
    %c1_87 = arith.constant 1 : index
    %c0_88 = arith.constant 0 : index
    %c19_89 = arith.constant 19 : index
    %87 = vector.load %arg0[%c1_87, %c0_88, %c19_89] : memref<2x16x342xf32, #tpu.memory_space<vmem>>, vector<1x16x288xf32>
    %88 = vector.shape_cast %87 : vector<1x16x288xf32> to vector<16x288xf32>
    %c4_90 = arith.constant 4 : index
    %c0_91 = arith.constant 0 : index
    %c0_92 = arith.constant 0 : index
    %89 = vector.load %arg1[%c4_90, %c0_91, %c0_92] : memref<9x32x16xf32, #tpu.memory_space<vmem>>, vector<1x32x16xf32>
    %90 = vector.shape_cast %89 : vector<1x32x16xf32> to vector<32x16xf32>
    %cst_93 = arith.constant dense<0.000000e+00> : vector<32x288xf32>
    %91 = tpu.matmul %90, %88, %cst_93 {dimension_numbers = #tpu.dot_dimension_numbers<[1], [0], [0], [1], [0, 0, 1, 1], [], []>} : vector<32x16xf32>, vector<16x288xf32>, vector<32x288xf32> -> vector<32x288xf32>
    %92 = arith.addf %86, %91 : vector<32x288xf32>
    %c1_94 = arith.constant 1 : index
    %c0_95 = arith.constant 0 : index
    %c20_96 = arith.constant 20 : index
    %93 = vector.load %arg0[%c1_94, %c0_95, %c20_96] : memref<2x16x342xf32, #tpu.memory_space<vmem>>, vector<1x16x288xf32>
    %94 = vector.shape_cast %93 : vector<1x16x288xf32> to vector<16x288xf32>
    %c5_97 = arith.constant 5 : index
    %c0_98 = arith.constant 0 : index
    %c0_99 = arith.constant 0 : index
    %95 = vector.load %arg1[%c5_97, %c0_98, %c0_99] : memref<9x32x16xf32, #tpu.memory_space<vmem>>, vector<1x32x16xf32>
    %96 = vector.shape_cast %95 : vector<1x32x16xf32> to vector<32x16xf32>
    %cst_100 = arith.constant dense<0.000000e+00> : vector<32x288xf32>
    %97 = tpu.matmul %96, %94, %cst_100 {dimension_numbers = #tpu.dot_dimension_numbers<[1], [0], [0], [1], [0, 0, 1, 1], [], []>} : vector<32x16xf32>, vector<16x288xf32>, vector<32x288xf32> -> vector<32x288xf32>
    %98 = arith.addf %92, %97 : vector<32x288xf32>
    %c1_101 = arith.constant 1 : index
    %c0_102 = arith.constant 0 : index
    %c36_103 = arith.constant 36 : index
    %99 = vector.load %arg0[%c1_101, %c0_102, %c36_103] : memref<2x16x342xf32, #tpu.memory_space<vmem>>, vector<1x16x288xf32>
    %100 = vector.shape_cast %99 : vector<1x16x288xf32> to vector<16x288xf32>
    %c6_104 = arith.constant 6 : index
    %c0_105 = arith.constant 0 : index
    %c0_106 = arith.constant 0 : index
    %101 = vector.load %arg1[%c6_104, %c0_105, %c0_106] : memref<9x32x16xf32, #tpu.memory_space<vmem>>, vector<1x32x16xf32>
    %102 = vector.shape_cast %101 : vector<1x32x16xf32> to vector<32x16xf32>
    %cst_107 = arith.constant dense<0.000000e+00> : vector<32x288xf32>
    %103 = tpu.matmul %102, %100, %cst_107 {dimension_numbers = #tpu.dot_dimension_numbers<[1], [0], [0], [1], [0, 0, 1, 1], [], []>} : vector<32x16xf32>, vector<16x288xf32>, vector<32x288xf32> -> vector<32x288xf32>
    %104 = arith.addf %98, %103 : vector<32x288xf32>
    %c1_108 = arith.constant 1 : index
    %c0_109 = arith.constant 0 : index
    %c37_110 = arith.constant 37 : index
    %105 = vector.load %arg0[%c1_108, %c0_109, %c37_110] : memref<2x16x342xf32, #tpu.memory_space<vmem>>, vector<1x16x288xf32>
    %106 = vector.shape_cast %105 : vector<1x16x288xf32> to vector<16x288xf32>
    %c7_111 = arith.constant 7 : index
    %c0_112 = arith.constant 0 : index
    %c0_113 = arith.constant 0 : index
    %107 = vector.load %arg1[%c7_111, %c0_112, %c0_113] : memref<9x32x16xf32, #tpu.memory_space<vmem>>, vector<1x32x16xf32>
    %108 = vector.shape_cast %107 : vector<1x32x16xf32> to vector<32x16xf32>
    %cst_114 = arith.constant dense<0.000000e+00> : vector<32x288xf32>
    %109 = tpu.matmul %108, %106, %cst_114 {dimension_numbers = #tpu.dot_dimension_numbers<[1], [0], [0], [1], [0, 0, 1, 1], [], []>} : vector<32x16xf32>, vector<16x288xf32>, vector<32x288xf32> -> vector<32x288xf32>
    %110 = arith.addf %104, %109 : vector<32x288xf32>
    %c1_115 = arith.constant 1 : index
    %c0_116 = arith.constant 0 : index
    %c38_117 = arith.constant 38 : index
    %111 = vector.load %arg0[%c1_115, %c0_116, %c38_117] : memref<2x16x342xf32, #tpu.memory_space<vmem>>, vector<1x16x288xf32>
    %112 = vector.shape_cast %111 : vector<1x16x288xf32> to vector<16x288xf32>
    %c8_118 = arith.constant 8 : index
    %c0_119 = arith.constant 0 : index
    %c0_120 = arith.constant 0 : index
    %113 = vector.load %arg1[%c8_118, %c0_119, %c0_120] : memref<9x32x16xf32, #tpu.memory_space<vmem>>, vector<1x32x16xf32>
    %114 = vector.shape_cast %113 : vector<1x32x16xf32> to vector<32x16xf32>
    %cst_121 = arith.constant dense<0.000000e+00> : vector<32x288xf32>
    %115 = tpu.matmul %114, %112, %cst_121 {dimension_numbers = #tpu.dot_dimension_numbers<[1], [0], [0], [1], [0, 0, 1, 1], [], []>} : vector<32x16xf32>, vector<16x288xf32>, vector<32x288xf32> -> vector<32x288xf32>
    %116 = arith.addf %110, %115 : vector<32x288xf32>
    %117 = vector.broadcast %0 : vector<1x288xf32> to vector<32x288xf32>
    %118 = arith.mulf %116, %117 : vector<32x288xf32>
    %cst_122 = arith.constant dense<0.000000e+00> : vector<32xf32>
    %119 = vector.multi_reduction <add>, %118, %cst_122 [1] : vector<32x288xf32> to vector<32xf32>
    %120 = vector.shape_cast %119 : vector<32xf32> to vector<32x1xf32>
    %121 = arith.addf %63, %120 : vector<32x1xf32>
    %cst_123 = arith.constant 0.001953125 : f32
    %122 = vector.broadcast %cst_123 : f32 to vector<32x1xf32>
    %123 = arith.mulf %121, %122 : vector<32x1xf32>
    %124 = vector.broadcast %123 : vector<32x1xf32> to vector<32x288xf32>
    %125 = arith.subf %59, %124 : vector<32x288xf32>
    %126 = vector.broadcast %0 : vector<1x288xf32> to vector<32x288xf32>
    %127 = arith.mulf %125, %126 : vector<32x288xf32>
    %128 = vector.broadcast %123 : vector<32x1xf32> to vector<32x288xf32>
    %129 = arith.subf %116, %128 : vector<32x288xf32>
    %130 = vector.broadcast %0 : vector<1x288xf32> to vector<32x288xf32>
    %131 = arith.mulf %129, %130 : vector<32x288xf32>
    %132 = arith.mulf %127, %127 : vector<32x288xf32>
    %cst_124 = arith.constant dense<0.000000e+00> : vector<32xf32>
    %133 = vector.multi_reduction <add>, %132, %cst_124 [1] : vector<32x288xf32> to vector<32xf32>
    %134 = vector.shape_cast %133 : vector<32xf32> to vector<32x1xf32>
    %135 = arith.mulf %131, %131 : vector<32x288xf32>
    %cst_125 = arith.constant dense<0.000000e+00> : vector<32xf32>
    %136 = vector.multi_reduction <add>, %135, %cst_125 [1] : vector<32x288xf32> to vector<32xf32>
    %137 = vector.shape_cast %136 : vector<32xf32> to vector<32x1xf32>
    %138 = arith.addf %134, %137 : vector<32x1xf32>
    %cst_126 = arith.constant 0.001953125 : f32
    %139 = vector.broadcast %cst_126 : f32 to vector<32x1xf32>
    %140 = arith.mulf %138, %139 : vector<32x1xf32>
    %cst_127 = arith.constant 9.99999974E-6 : f32
    %141 = vector.broadcast %cst_127 : f32 to vector<32x1xf32>
    %142 = arith.addf %140, %141 : vector<32x1xf32>
    %143 = math.rsqrt %142 : vector<32x1xf32>
    %144 = arith.mulf %3, %143 : vector<32x1xf32>
    %145 = arith.mulf %123, %144 : vector<32x1xf32>
    %146 = arith.subf %4, %145 : vector<32x1xf32>
    %147 = vector.broadcast %144 : vector<32x1xf32> to vector<32x288xf32>
    %148 = arith.mulf %59, %147 : vector<32x288xf32>
    %149 = vector.broadcast %146 : vector<32x1xf32> to vector<32x288xf32>
    %150 = arith.addf %148, %149 : vector<32x288xf32>
    %cst_128 = arith.constant 3.906250e-03 : f32
    %151 = vector.broadcast %cst_128 : f32 to vector<32x1xf32>
    %152 = arith.mulf %63, %151 : vector<32x1xf32>
    %153 = arith.mulf %144, %152 : vector<32x1xf32>
    %154 = arith.addf %153, %146 : vector<32x1xf32>
    %cst_129 = arith.constant 0xFF800000 : f32
    %155 = vector.shape_cast %2 : vector<1x288xi1> to vector<1x288xi1>
    %156 = vector.broadcast %155 : vector<1x288xi1> to vector<32x288xi1>
    %157 = vector.broadcast %cst_129 : f32 to vector<32x288xf32>
    %158 = arith.select %156, %150, %157 : vector<32x288xi1>, vector<32x288xf32>
    %cst_130 = arith.constant dense<0xFF800000> : vector<32xf32>
    %159 = vector.multi_reduction <maximumf>, %158, %cst_130 [1] : vector<32x288xf32> to vector<32xf32>
    %160 = vector.shape_cast %159 : vector<32xf32> to vector<32x1xf32>
    %161 = vector.broadcast %144 : vector<32x1xf32> to vector<32x288xf32>
    %162 = arith.mulf %116, %161 : vector<32x288xf32>
    %163 = vector.broadcast %146 : vector<32x1xf32> to vector<32x288xf32>
    %164 = arith.addf %162, %163 : vector<32x288xf32>
    %cst_131 = arith.constant 3.906250e-03 : f32
    %165 = vector.broadcast %cst_131 : f32 to vector<32x1xf32>
    %166 = arith.mulf %120, %165 : vector<32x1xf32>
    %167 = arith.mulf %144, %166 : vector<32x1xf32>
    %168 = arith.addf %167, %146 : vector<32x1xf32>
    %cst_132 = arith.constant 0xFF800000 : f32
    %169 = vector.shape_cast %2 : vector<1x288xi1> to vector<1x288xi1>
    %170 = vector.broadcast %169 : vector<1x288xi1> to vector<32x288xi1>
    %171 = vector.broadcast %cst_132 : f32 to vector<32x288xf32>
    %172 = arith.select %170, %164, %171 : vector<32x288xi1>, vector<32x288xf32>
    %cst_133 = arith.constant dense<0xFF800000> : vector<32xf32>
    %173 = vector.multi_reduction <maximumf>, %172, %cst_133 [1] : vector<32x288xf32> to vector<32xf32>
    %174 = vector.shape_cast %173 : vector<32xf32> to vector<32x1xf32>
    %175 = tpu.concatenate %154, %160, %168, %174 in 1 : vector<32x1xf32>, vector<32x1xf32>, vector<32x1xf32>, vector<32x1xf32> -> vector<32x4xf32>
    %176 = vector.extract_strided_slice %5 {offsets = [0, 0], sizes = [32, 1], strides = [1, 1]} : vector<32x2xf32> to vector<32x1xf32>
    %177 = vector.broadcast %176 : vector<32x1xf32> to vector<32x4xf32>
    %178 = arith.mulf %177, %175 : vector<32x4xf32>
    %179 = vector.extract_strided_slice %5 {offsets = [0, 1], sizes = [32, 1], strides = [1, 1]} : vector<32x2xf32> to vector<32x1xf32>
    %180 = vector.broadcast %179 : vector<32x1xf32> to vector<32x4xf32>
    %181 = arith.mulf %180, %175 : vector<32x4xf32>
    %182 = tpu.concatenate %178, %181 in 1 : vector<32x4xf32>, vector<32x4xf32> -> vector<32x8xf32>
    %cst_134 = arith.constant dense<0.000000e+00> : vector<8xf32>
    %183 = vector.multi_reduction <add>, %182, %cst_134 [0] : vector<32x8xf32> to vector<8xf32>
    %184 = vector.shape_cast %183 : vector<8xf32> to vector<1x8xf32>
    %cst_135 = arith.constant 0.000000e+00 : f32
    %185 = vector.broadcast %cst_135 : f32 to vector<1x8xf32>
    %186 = arith.maximumf %184, %185 : vector<1x8xf32>
    %187 = vector.extract_strided_slice %6 {offsets = [0, 0], sizes = [32, 1], strides = [1, 1]} : vector<32x2xf32> to vector<32x1xf32>
    %188 = vector.extract_strided_slice %186 {offsets = [0, 0], sizes = [1, 4], strides = [1, 1]} : vector<1x8xf32> to vector<1x4xf32>
    %189 = vector.broadcast %187 : vector<32x1xf32> to vector<32x4xf32>
    %190 = vector.broadcast %188 : vector<1x4xf32> to vector<32x4xf32>
    %191 = arith.mulf %189, %190 : vector<32x4xf32>
    %192 = vector.extract_strided_slice %6 {offsets = [0, 1], sizes = [32, 1], strides = [1, 1]} : vector<32x2xf32> to vector<32x1xf32>
    %193 = vector.extract_strided_slice %186 {offsets = [0, 4], sizes = [1, 4], strides = [1, 1]} : vector<1x8xf32> to vector<1x4xf32>
    %194 = vector.broadcast %192 : vector<32x1xf32> to vector<32x4xf32>
    %195 = vector.broadcast %193 : vector<1x4xf32> to vector<32x4xf32>
    %196 = arith.mulf %194, %195 : vector<32x4xf32>
    %197 = arith.addf %191, %196 : vector<32x4xf32>
    %198 = vector.extract_strided_slice %197 {offsets = [0, 0], sizes = [32, 1], strides = [1, 1]} : vector<32x4xf32> to vector<32x1xf32>
    %199 = vector.extract_strided_slice %197 {offsets = [0, 1], sizes = [32, 1], strides = [1, 1]} : vector<32x4xf32> to vector<32x1xf32>
    %200 = arith.addf %198, %199 : vector<32x1xf32>
    %201 = arith.negf %200 : vector<32x1xf32>
    %202 = math.exp %201 : vector<32x1xf32>
    %cst_136 = arith.constant 1.000000e+00 : f32
    %203 = vector.broadcast %cst_136 : f32 to vector<32x1xf32>
    %204 = arith.addf %203, %202 : vector<32x1xf32>
    %205 = arith.divf %203, %204 : vector<32x1xf32>
    %206 = vector.broadcast %205 : vector<32x1xf32> to vector<32x288xf32>
    %207 = arith.mulf %150, %206 : vector<32x288xf32>
    %cst_137 = arith.constant 0.000000e+00 : f32
    %208 = vector.broadcast %cst_137 : f32 to vector<32x288xf32>
    %209 = arith.maximumf %207, %208 : vector<32x288xf32>
    %c0_138 = arith.constant 0 : index
    %c0_139 = arith.constant 0 : index
    %c0_140 = arith.constant 0 : index
    %210 = vector.load %arg4[%c0_138, %c0_139, %c0_140] : memref<2x32x288xf32, #tpu.memory_space<vmem>>, vector<1x32x288xf32>
    %211 = vector.shape_cast %210 : vector<1x32x288xf32> to vector<32x288xf32>
    %212 = vector.shape_cast %209 : vector<32x288xf32> to vector<1x32x288xf32>
    tpu.vector_store %arg4[%c0_138, %c0_139, %c0_140], %212 {strides = array<i32>} : memref<2x32x288xf32, #tpu.memory_space<vmem>>, vector<1x32x288xf32>,
    %213 = vector.extract_strided_slice %197 {offsets = [0, 2], sizes = [32, 1], strides = [1, 1]} : vector<32x4xf32> to vector<32x1xf32>
    %214 = vector.extract_strided_slice %197 {offsets = [0, 3], sizes = [32, 1], strides = [1, 1]} : vector<32x4xf32> to vector<32x1xf32>
    %215 = arith.addf %213, %214 : vector<32x1xf32>
    %216 = arith.negf %215 : vector<32x1xf32>
    %217 = math.exp %216 : vector<32x1xf32>
    %cst_141 = arith.constant 1.000000e+00 : f32
    %218 = vector.broadcast %cst_141 : f32 to vector<32x1xf32>
    %219 = arith.addf %218, %217 : vector<32x1xf32>
    %220 = arith.divf %218, %219 : vector<32x1xf32>
    %221 = vector.broadcast %220 : vector<32x1xf32> to vector<32x288xf32>
    %222 = arith.mulf %164, %221 : vector<32x288xf32>
    %cst_142 = arith.constant 0.000000e+00 : f32
    %223 = vector.broadcast %cst_142 : f32 to vector<32x288xf32>
    %224 = arith.maximumf %222, %223 : vector<32x288xf32>
    %c1_143 = arith.constant 1 : index
    %c0_144 = arith.constant 0 : index
    %c0_145 = arith.constant 0 : index
    %225 = vector.load %arg4[%c1_143, %c0_144, %c0_145] : memref<2x32x288xf32, #tpu.memory_space<vmem>>, vector<1x32x288xf32>
    %226 = vector.shape_cast %225 : vector<1x32x288xf32> to vector<32x288xf32>
    %227 = vector.shape_cast %224 : vector<32x288xf32> to vector<1x32x288xf32>
    tpu.vector_store %arg4[%c1_143, %c0_144, %c0_145], %227 {strides = array<i32>} : memref<2x32x288xf32, #tpu.memory_space<vmem>>, vector<1x32x288xf32>,
    return
  }
}

</mosaic_0001>

<bundles_post_ra>
// kernel: basic_block_sem.1
= control target key start
LH: loop header
LB: loop body
LE: loop exit
PB: predicated region body
PF: predicated region fallthrough
CT: control target
= control target key end

     0   :  { %vm67_vm0 = vcmask 130048   ;;  %s5773_s27 = smov 127   ;;  %s5774_s30 = smov 126   ;;  %v7577_v13 = vmov 0.0   ;;  %vm56_vm1 = vcmask 1039360   ;;  %vm457_vm2 = vcmask 1031168   ;;  %s7561_s0 = inlined_call_operand.vmem [shape: f32[2,16,342], index: 0, kind: input, shape index: {}]   ;;  %s7562_s1 = inlined_call_operand.vmem [shape: f32[9,32,16], index: 1, kind: input, shape index: {}]   ;;  %s7563_s3 = inlined_call_operand.vmem [shape: f32[1,288], index: 3, kind: input, shape index: {}]   ;;  %s7564_s2 = inlined_call_operand.vmem [shape: f32[32,6], index: 2, kind: input, shape index: {}]   ;;  %s7565_s4 = inlined_call_operand.vmem [shape: f32[2,32,288], index: 4, kind: output, shape index: {}]  }
   0x1   :  { %v5820_v0 = vld [vmem:[%s7561_s0 + $0x8] sm:$0xff]  ;;  %v25_v1 = vld [vmem:[%s7561_s0 + $0x10] sm:$0xff]  ;;  %v5828_v2 = vld [vmem:[%s7561_s0] sm:$0xff]  ;;  %s5775_s5 = smov 110   ;;  %s5776_s6 = smov 109   ;;  %144 = vmatprep.mubr.f32.mxu0 %v7577_v13  ;;  %vm683_vm3 = vcmask 900096  }
   0x2   :  { %v5479_v3 = vpack.i.bf16 %v25_v1, %v5820_v0  ;;  %v5834_v4 = vld [vmem:[%s7561_s0 + $0x18] sm:$0xff]  ;;  %v5839_v5 = vld [vmem:[%s7561_s0 + $0x20] sm:$0xff]  ;;  %v28_v6 = vld [vmem:[%s7561_s0 + $0x28] sm:$0xff]  ;;  %s5778_s7 = smov 108   ;;  %s5779_s12 = smov 92   ;;  %vm909_vm4 = vcmask 891904  }
   0x3   :  { %v5846_v7 = vpack.i.bf16 %v5834_v4, %v5828_v2  ;;  %v5484_v8 = vpack.i.bf16 %v28_v6, %v5839_v5  ;;  %v5494_v9 = vpack.i.bf16 %v28_v6, %v25_v1  ;;  %v5855_v10 = vld [vmem:[%s7562_s1] sm:$0xff]  ;;  %v5514_v11 = vpack.i.bf16 %v5839_v5, %v5820_v0  ;;  %v5871_v14 = vld [vmem:[%s7562_s1 + $0x8] sm:$0xff]  ;;  %v5876_v15 = vld [vmem:[%s7562_s1 + $0x10] sm:$0xff]  ;;  %s5780_s17 = smov 91   ;;  %s5781_s22 = smov 90  }
   0x4   :  { %5480 = vrot.lane.b32.xlu0 %v5479_v3, %s5773_s27  ;;  %4958 = vmatprep.mubr.msk.f32.mxu1 %vm67_vm0, %v5855_v10  ;;  %v5136_v12 = vpack.c.bf16 %v28_v6, %v25_v1  ;;  %v5132_v16 = vpack.c.bf16 %v5839_v5, %v5820_v0  ;;  %v5134_v17 = vpack.c.bf16 %v5834_v4, %v5828_v2  ;;  %v5892_v18 = vld [vmem:[%s7562_s1 + $0x18] sm:$0xff]  ;;  %v5897_v19 = vld [vmem:[%s7562_s1 + $0x40] sm:$0xff]  ;;  %v5928_v25 = vld [vmem:[%s7561_s0 + $0x50] sm:$0xff]  ;;  %vm1813_vm5 = vcmask 736256   ;;  %s5789_s29 = smov 4   ;;  %s5791_s8 = smov 124  }
   0x5   :  { %5490 = vrot.lane.b32.xlu1 %v5846_v7, %s5773_s27  ;;  %v4744_v20 = vld [vmem:[%s7561_s0 + $0x40] sm:$0xff]  ;;  %v4747_v21 = vld [vmem:[%s7561_s0 + $0x58] sm:$0xff]  ;;  %7613 = vst [vmem:[#allocation2_spill] sm:$0xff] %v5928_v25  ;;  %v4742_v26 = vld [vmem:[%s7561_s0 + $0x30] sm:$0xff]  ;;  %vm1135_vm6 = vcmask 883712   ;;  %vm1361_vm7 = vcmask 752640  }
   0x6   :  { %5137 = vmatprep.subr.bf16.mxu1 %v5136_v12  ;;  %v5549_v22 = vpack.i.bf16 %v4747_v21, %v4744_v20  ;;  %v4743_v23 = vld [vmem:[%s7561_s0 + $0x38] sm:$0xff]  ;;  %v4745_v27 = vld [vmem:[%s7561_s0 + $0x48] sm:$0xff]  ;;  %v5589_v28 = vpack.i.bf16 %v4747_v21, %v5928_v25  ;;  %v5949_v30 = vpack.c.bf16 %v4747_v21, %v4744_v20  ;;  %v5999_v59 = vld [vmem:[%s7562_s1 + $0x20] sm:$0xff]  ;;  %vm1587_vm8 = vcmask 744448  }
   0x7   :  { %5139 = vmatpush3.bf16.msra.mxu1 %v5136_v12  ;;  %v5584_v24 = vpack.i.bf16 %v4744_v20, %v4743_v23  ;;  %v5594_v29 = vpack.i.bf16 %v4745_v27, %v4742_v26  ;;  %v5659_v31 = vpack.i.bf16 %v5928_v25, %v4743_v23  ;;  %v5994_v58 = vld [vmem:[%s7562_s1 + $0x48] sm:$0xff]  ;;  %7614 = vst [vmem:[#allocation3_spill] sm:$0xff] %v5999_v59  ;;  %v6010_v62 = vld [vmem:[%s7562_s1 + $0x50] sm:$0xff]  ;;  %v6027_v3 = vld [vmem:[%s7562_s1 + $0x58] sm:$0xff]  ;;  %vm2051_vm9 = vcmask 261120  }
   0x8   :  { %5485 = vrot.lane.b32.xlu0 %v5484_v8, %s5773_s27  ;;  %v6032_v6 = vld [vmem:[%s7562_s1 + $0x28] sm:$0xff]  ;;  %v6038_v8 = vld [vmem:[%s7562_s1 + $0x60] sm:$0xff]  ;;  %v6062_v0 = vld [vmem:[%s7562_s1 + $0x30] sm:$0xff]  ;;  %vm4326_vm14 = vcmask 7168   ;;  %vm4331_vm15 = vcmask 15360  }
   0x9   :  { %5495 = vrot.lane.b32.xlu1 %v5494_v9, %s5774_s30  ;;  %7615 = vst [vmem:[#allocation4_spill] sm:$0xff] %v6032_v6  ;;  %v6057_v20 = vld [vmem:[%s7562_s1 + $0x68] sm:$0xff]  ;;  %7616 = vst [vmem:[#allocation5_spill] sm:$0xff] %v6062_v0  ;;  %v6089_v26 = vld [vmem:[%s7562_s1 + $0x78] sm:$0xff] }
   0xa   :  { %4959 = vmatmul.mubr.msk.f32.vlgmr.msra.gmra.mrb[0].mxu1 %vm67_vm0, %v5871_v14  ;;  %v6094_v27 = vld [vmem:[%s7562_s1 + $0x38] sm:$0xff]  ;;  %v6160_v2 = vld [vmem:[%s7562_s1 + $0xa0] sm:$0xff] }
   0xb   :  { %4961 = vmatprep.mubr.msk.f32.mxu1 %vm67_vm0, %v5876_v15  ;;  %7617 = vst [vmem:[#allocation6_spill] sm:$0xff] %v6094_v27 }
   0xc   :  { %5500 = vrot.lane.b32.xlu0 %v5494_v9, %s5775_s5 }
   0xd   :  { %5505 = vrot.lane.b32.xlu1 %v5494_v9, %s5776_s6 }
   0xe   :  { %4962 = vmatmul.mubr.msk.f32.gmra.mrb[2].mxu1 %vm67_vm0, %v5892_v18 }
   0xf   :  { %4968 = vmatprep.mubr.msk.f32.mxu1 %vm67_vm0, %v5897_v19 }
  0x10   :  { %5510 = vrot.lane.b32.xlu0 %v5494_v9, %s5778_s7 }
  0x11   :  { %5515 = vrot.lane.b32.xlu1 %v5514_v11, %s5774_s30 }
  0x14   :  { %5520 = vrot.lane.b32.xlu0 %v5846_v7, %s5774_s30 }
  0x15   :  { %5525 = vrot.lane.b32.xlu1 %v5494_v9, %s5779_s12 }
  0x18   :  { %5530 = vrot.lane.b32.xlu0 %v5494_v9, %s5780_s17 }
  0x19   :  { %5535 = vrot.lane.b32.xlu1 %v5514_v11, %s5775_s5 }
  0x1c   :  { %5540 = vrot.lane.b32.xlu0 %v5846_v7, %s5775_s5 }
  0x1d   :  { %5545 = vrot.lane.b32.xlu1 %v5494_v9, %s5781_s22 }
  0x20   :  { %5550 = vrot.lane.b32.xlu0 %v5549_v22, %s5773_s27 }
  0x21   :  { %5555 = vrot.lane.b32.xlu1 %v5514_v11, %s5776_s6 }
  0x24   :  { %5560 = vrot.lane.b32.xlu0 %v5846_v7, %s5776_s6 }
  0x25   :  { %5565 = vrot.lane.b32.xlu1 %v5549_v22, %s5774_s30 }
  0x28   :  { %5570 = vrot.lane.b32.xlu0 %v5514_v11, %s5778_s7 }
  0x29   :  { %5575 = vrot.lane.b32.xlu1 %v5846_v7, %s5778_s7 }
  0x2c   :  { %5580 = vrot.lane.b32.xlu0 %v5549_v22, %s5775_s5 }
  0x2d   :  { %5585 = vrot.lane.b32.xlu1 %v5584_v24, %s5776_s6 }
  0x30   :  { %5590 = vrot.lane.b32.xlu0 %v5589_v28, %s5776_s6 }
  0x31   :  { %5595 = vrot.lane.b32.xlu1 %v5594_v29, %s5776_s6 }
  0x34   :  { %5600 = vrot.lane.b32.xlu0 %v5514_v11, %s5779_s12 }
  0x35   :  { %5605 = vrot.lane.b32.xlu1 %v5846_v7, %s5779_s12 }
  0x38   :  { %5610 = vrot.lane.b32.xlu0 %v5514_v11, %s5780_s17 }
  0x39   :  { %5615 = vrot.lane.b32.xlu1 %v5846_v7, %s5780_s17 }
  0x3c   :  { %5620 = vrot.lane.b32.xlu0 %v5584_v24, %s5778_s7 }
  0x3d   :  { %5625 = vrot.lane.b32.xlu1 %v5589_v28, %s5778_s7 }
  0x40   :  { %5630 = vrot.lane.b32.xlu0 %v5594_v29, %s5778_s7 }
  0x41   :  { %5635 = vrot.lane.b32.xlu1 %v5514_v11, %s5781_s22 }
  0x44   :  { %5640 = vrot.lane.b32.xlu0 %v5846_v7, %s5781_s22 }
  0x45   :  { %5645 = vrot.lane.b32.xlu1 %v5584_v24, %s5779_s12 }
  0x48   :  { %5650 = vrot.lane.b32.xlu0 %v5589_v28, %s5779_s12 }
  0x49   :  { %5655 = vrot.lane.b32.xlu1 %v5594_v29, %s5779_s12 }
  0x4c   :  { %5660 = vrot.lane.b32.xlu0 %v5659_v31, %s5773_s27 }
  0x4d   :  { %5665 = vrot.lane.b32.xlu1 %v5594_v29, %s5773_s27 }
  0x50   :  { %5670 = vrot.lane.b32.xlu0 %v5584_v24, %s5780_s17 }
  0x51   :  { %5675 = vrot.lane.b32.xlu1 %v5589_v28, %s5780_s17 }
  0x54   :  { %5680 = vrot.lane.b32.xlu0 %v5594_v29, %s5780_s17 }
  0x55   :  { %5685 = vrot.lane.b32.xlu1 %v5659_v31, %s5774_s30 }
  0x58   :  { %5690 = vrot.lane.b32.xlu0 %v5594_v29, %s5774_s30 }
  0x59   :  { %5695 = vrot.lane.b32.xlu1 %v5584_v24, %s5781_s22 }
  0x5c   :  { %5700 = vrot.lane.b32.xlu0 %v5589_v28, %s5781_s22 }
  0x5d   :  { %5705 = vrot.lane.b32.xlu1 %v5594_v29, %s5781_s22 }
  0x60   :  { %5710 = vrot.lane.b32.xlu0 %v5659_v31, %s5775_s5 }
  0x61   :  { %5715 = vrot.lane.b32.xlu1 %v5594_v29, %s5775_s5  ;;  %v6101_v29 = vld [vmem:[%s7562_s1 + $0x80] sm:$0xff] }
  0x76   :  { %v5481_v32 = vpop.permute.xlu0 %5480 }
  0x77   :  { %v5491_v33 = vpop.permute.xlu1 %5490  ;;  %v5483_v34 = vunpack.i.h.bf16 %v5481_v32  ;;  %v5482_v35 = vunpack.i.l.bf16 %v5481_v32  ;;  %v6116_v32 = vld [vmem:[%s7562_s1 + $0x88] sm:$0xff] }
  0x78   :  { %v5493_v36 = vunpack.i.h.bf16 %v5491_v33  ;;  %v5492_v37 = vunpack.i.l.bf16 %v5491_v33 }
  0x79   :  { %v58_v44 = vsel %vm56_vm1, %v5482_v35, %v5483_v34 }
  0x7a   :  { %v5486_v38 = vpop.permute.xlu0 %5485  ;;  %v57_v46 = vsel %vm56_vm1, %v5492_v37, %v5482_v35 }
  0x7b   :  { %v5488_v39 = vunpack.i.h.bf16 %v5486_v38  ;;  %v5487_v40 = vunpack.i.l.bf16 %v5486_v38  ;;  %v5971_v41 = vpop.permute.xlu1 %5495 }
  0x7c   :  { %v5498_v42 = vunpack.i.h.bf16 %v5971_v41  ;;  %v5497_v43 = vunpack.i.l.bf16 %v5971_v41 }
  0x7d   :  { %v60_v45 = vsel %vm56_vm1, %v5487_v40, %v5488_v39  ;;  %v59_v47 = vsel %vm56_vm1, %v5493_v36, %v5487_v40  ;;  %v5128_v57 = vpack.c.bf16 %v5488_v39, %v5483_v34  ;;  %v6131_v40 = vld [vmem:[%s7562_s1 + $0x90] sm:$0xff] }
  0x7e   :  { %v5979_v48 = vpop.permute.xlu0 %5500  ;;  %v5144_v49 = vpack.c.bf16 %v5498_v42, %v5497_v43  ;;  %v5124_v50 = vpack.c.bf16 %v60_v45, %v58_v44  ;;  %v5126_v51 = vpack.c.bf16 %v59_v47, %v57_v46  ;;  %v6149_v45 = vld [vmem:[%s7562_s1 + $0x98] sm:$0xff] }
  0x7f   :  { %v5503_v52 = vunpack.i.h.bf16 %v5979_v48  ;;  %v5502_v53 = vunpack.i.l.bf16 %v5979_v48  ;;  %v5987_v54 = vpop.permute.xlu1 %5505 }
  0x80   :  { %v5508_v55 = vunpack.i.h.bf16 %v5987_v54  ;;  %v5507_v56 = vunpack.i.l.bf16 %v5987_v54  ;;  %5145 = vmatprep.subr.bf16.mxu1 %v5144_v49  ;;  %5125 = vmatprep.subr.bf16.mxu0 %v5124_v50  ;;  %v6178_v50 = vld [vmem:[%s7562_s1 + $0xa8] sm:$0xff] }
  0x81   :  { %5147 = vmatpush3.bf16.msra.mxu1 %v5144_v49  ;;  %5127 = vmatpush1.bf16.msra.mxu0 %v5126_v51  ;;  %v5152_v60 = vpack.c.bf16 %v5503_v52, %v5502_v53 }
  0x82   :  { %v6005_v61 = vpop.permute.xlu0 %5510  ;;  %5129 = vmatprep.subr.bf16.mxu0 %v5128_v57  ;;  %v5160_v1 = vpack.c.bf16 %v5508_v55, %v5507_v56 }
  0x83   :  { %v6012_v63 = vpop.permute.xlu1 %5515  ;;  %5153 = vmatprep.subr.bf16.mxu1 %v5152_v60  ;;  %v7570_v9 = vunpack.i.h.bf16 %v6005_v61  ;;  %v7571_v11 = vunpack.i.l.bf16 %v6005_v61 }
  0x84   :  { %4969 = vmatmul.mubr.msk.f32.vlgmr.msra.gmra.mrb[0].mxu1 %vm67_vm0, %v5994_v58  ;;  %4642 = vmatmul.mubr.msk.f32.vlgmr.msra.gmra.mrb[0].mxu0 %vm67_vm0, %v5999_v59  ;;  %v5518_v23 = vunpack.i.h.bf16 %v6012_v63  ;;  %v5517_v24 = vunpack.i.l.bf16 %v6012_v63 }
  0x85   :  { %5131 = vmatpush3.bf16.msra.mxu0 %v5128_v57  ;;  %4971 = vmatprep.mubr.msk.f32.mxu1 %vm67_vm0, %v6010_v62  ;;  %v5168_v22 = vpack.c.bf16 %v7570_v9, %v7571_v11  ;;  %v6280_v9 = vld [vmem:[%s7562_s1 + $0xe0] sm:$0xff] }
  0x86   :  { %v5521_v7 = vpop.permute.xlu0 %5520  ;;  %150 = vmatprep.mubr.f32.mxu0 %v7577_v13  ;;  %5155 = vmatpush3.bf16.msra.mxu1 %v5152_v60  ;;  %v459_v33 = vsel %vm457_vm2, %v5517_v24, %v5497_v43  ;;  %v461_v34 = vsel %vm457_vm2, %v5518_v23, %v5498_v42  ;;  %7620 = vst [vmem:[#allocation9_spill] sm:$0xff] %v6280_v9 }
  0x87   :  { %v6042_v12 = vpop.permute.xlu1 %5525  ;;  %5161 = vmatprep.subr.bf16.mxu1 %v5160_v1  ;;  %5133 = vmatprep.subr.bf16.mxu0 %v5132_v16  ;;  %v6069_v16 = vld [vmem:[%s7562_s1 + $0x70] sm:$0xff]  ;;  %v5523_v35 = vunpack.i.h.bf16 %v5521_v7  ;;  %v5522_v36 = vunpack.i.l.bf16 %v5521_v7  ;;  %v5140_v41 = vpack.c.bf16 %v461_v34, %v459_v33 }
  0x88   :  { %4972 = vmatmul.mubr.msk.f32.gmra.mrb[2].mxu1 %vm67_vm0, %v6027_v3  ;;  %4643 = vmatmul.mubr.msk.f32.gmra.mrb[2].mxu0 %vm67_vm0, %v6032_v6  ;;  %v7568_v37 = vunpack.i.h.bf16 %v6042_v12  ;;  %v7569_v38 = vunpack.i.l.bf16 %v6042_v12 }
  0x89   :  { %4978 = vmatprep.mubr.msk.f32.mxu1 %vm67_vm0, %v6038_v8  ;;  %156 = vmatprep.mubr.f32.mxu0 %v7577_v13  ;;  %v458_v46 = vsel %vm457_vm2, %v5522_v36, %v5517_v24  ;;  %v460_v47 = vsel %vm457_vm2, %v5523_v35, %v5518_v23  ;;  %v6218_v24 = vld [vmem:[%s7562_s1 + $0xc0] sm:$0xff] }
  0x8a   :  { %v6064_v5 = vpop.permute.xlu0 %5530  ;;  %v5176_v4 = vpack.c.bf16 %v7568_v37, %v7569_v38  ;;  %v5142_v51 = vpack.c.bf16 %v460_v47, %v458_v46 }
  0x8b   :  { %v6071_v21 = vpop.permute.xlu1 %5535  ;;  %v7566_v63 = vunpack.i.h.bf16 %v6064_v5 }
  0x8c   :  { %4979 = vmatmul.mubr.msk.f32.vlgmr.msra.gmra.mrb[0].mxu1 %vm67_vm0, %v6057_v20  ;;  %4644 = vmatmul.mubr.msk.f32.gmra.mrb[4].mxu0 %vm67_vm0, %v6062_v0  ;;  %v5538_v42 = vunpack.i.h.bf16 %v6071_v21  ;;  %v5537_v43 = vunpack.i.l.bf16 %v6071_v21  ;;  %v6294_v21 = vld [vmem:[%s7562_s1 + $0xe8] sm:$0xff] }
  0x8d   :  { %4981 = vmatprep.mubr.msk.f32.mxu1 %vm67_vm0, %v6069_v16  ;;  %162 = vmatprep.mubr.f32.mxu0 %v7577_v13  ;;  %7621 = vst [vmem:[#allocation10_spill] sm:$0xff] %v6294_v21 }
  0x8e   :  { %v6096_v28 = vpop.permute.xlu0 %5540  ;;  %5163 = vmatpush3.bf16.msra.mxu1 %v5160_v1  ;;  %v685_v57 = vsel %vm683_vm3, %v5537_v43, %v5502_v53  ;;  %v687_v60 = vsel %vm683_vm3, %v5538_v42, %v5503_v52  ;;  %v7567_v1 = vunpack.i.l.bf16 %v6064_v5  ;;  %v6210_v52 = vld [vmem:[%s7562_s1 + $0xb8] sm:$0xff] }
  0x8f   :  { %v6103_v31 = vpop.permute.xlu1 %5545  ;;  %5169 = vmatprep.subr.bf16.mxu1 %v5168_v22  ;;  %v5148_v48 = vpack.c.bf16 %v687_v60, %v685_v57  ;;  %v5543_v46 = vunpack.i.h.bf16 %v6096_v28  ;;  %v5542_v47 = vunpack.i.l.bf16 %v6096_v28 }
  0x90   :  { %4982 = vmatmul.mubr.msk.f32.gmra.mrb[2].mxu1 %vm67_vm0, %v6089_v26  ;;  %4645 = vmatmul.mubr.msk.f32.gmra.mrb[6].mxu0 %vm67_vm0, %v6094_v27  ;;  %v5184_v33 = vpack.c.bf16 %v7566_v63, %v7567_v1  ;;  %v7572_v34 = vunpack.i.h.bf16 %v6103_v31  ;;  %v7573_v35 = vunpack.i.l.bf16 %v6103_v31  ;;  %v6267_v63 = vld [vmem:[%s7562_s1 + $0xd8] sm:$0xff] }
  0x91   :  { %4988 = vmatprep.mubr.msk.f32.mxu1 %vm67_vm0, %v6101_v29  ;;  %4948 = vmatprep.mubr.msk.f32.mxu0 %vm67_vm0, %v5999_v59  ;;  %7619 = vst [vmem:[#allocation8_spill] sm:$0xff] %v6267_v63  ;;  %v684_v1 = vsel %vm683_vm3, %v5542_v47, %v5537_v43  ;;  %v686_v37 = vsel %vm683_vm3, %v5543_v46, %v5538_v42 }
  0x92   :  { %v6126_v39 = vpop.permute.xlu0 %5550  ;;  %v5192_v60 = vpack.c.bf16 %v7572_v34, %v7573_v35  ;;  %v5150_v42 = vpack.c.bf16 %v686_v37, %v684_v1  ;;  %v6311_v37 = vld [vmem:[%s7562_s1 + $0xf0] sm:$0xff]  ;;  %v6332_v35 = vld [vmem:[%s7562_s1 + $0x100] sm:$0xff] }
  0x93   :  { %v6133_v44 = vpop.permute.xlu1 %5555  ;;  %v7574_v46 = vunpack.i.h.bf16 %v6126_v39  ;;  %v7575_v47 = vunpack.i.l.bf16 %v6126_v39  ;;  %7622 = vst [vmem:[#allocation11_spill] sm:$0xff] %v6311_v37  ;;  %7624 = vst [vmem:[#allocation13_spill] sm:$0xff] %v6332_v35 }
  0x94   :  { %4989 = vmatmul.mubr.msk.f32.vlgmr.msra.gmra.mrb[0].mxu1 %vm67_vm0, %v6116_v32  ;;  %4949 = vmatmul.mubr.msk.f32.vlgmr.msra.gmra.mrb[8].mxu0 %vm67_vm0, %v6032_v6  ;;  %v7576_v28 = vunpack.i.h.bf16 %v6133_v44 }
  0x95   :  { %5135 = vmatpush1.bf16.msra.mxu0 %v5134_v17  ;;  %4991 = vmatprep.mubr.msk.f32.mxu1 %vm67_vm0, %v6131_v40 }
  0x96   :  { %5141 = vmatprep.subr.bf16.mxu0 %v5140_v41  ;;  %v6153_v49 = vpop.permute.xlu0 %5560  ;;  %4951 = vmatprep.mubr.msk.f32.mxu0 %vm67_vm0, %v6062_v0  ;;  %v6238_v41 = vld [vmem:[%s7562_s1 + $0xc8] sm:$0xff] }
  0x97   :  { %v6166_v17 = vpop.permute.xlu1 %5565  ;;  %5171 = vmatpush3.bf16.msra.mxu1 %v5168_v22  ;;  %v6197_v22 = vld [vmem:[%s7562_s1 + $0xb0] sm:$0xff] }
  0x98   :  { %4992 = vmatmul.mubr.msk.f32.gmra.mrb[2].mxu1 %vm67_vm0, %v6149_v45  ;;  %4952 = vmatmul.mubr.msk.f32.gmra.mrb[10].mxu0 %vm67_vm0, %v6094_v27 }
  0x99   :  { %4998 = vmatprep.mubr.msk.f32.mxu1 %vm67_vm0, %v6160_v2  ;;  %330 = vmatprep.mubr.f32.mxu0 %v7577_v13 }
  0x9a   :  { %v6192_v7 = vpop.permute.xlu0 %5570  ;;  %5177 = vmatprep.subr.bf16.mxu1 %v5176_v4 }
  0x9b   :  { %v6199_v23 = vpop.permute.xlu1 %5575  ;;  %v5572_v25 = vunpack.i.l.bf16 %v6192_v7 }
  0x9c   :  { %4999 = vmatmul.mubr.msk.f32.vlgmr.msra.gmra.mrb[0].mxu1 %vm67_vm0, %v6178_v50  ;;  %4650 = vmatmul.mubr.msk.f32.vlgmr.msra.gmra.mrb[0].mxu0 %vm67_vm0, %v5855_v10 }
  0x9d   :  { %5143 = vmatpush1.bf16.msra.mxu0 %v5142_v51  ;;  %5001 = vmatprep.mubr.msk.f32.mxu1 %vm67_vm0, %v6197_v22  ;;  %v6247_v51 = vld [vmem:[%s7562_s1 + $0xd0] sm:$0xff] }
  0x9e   :  { %5149 = vmatprep.subr.bf16.mxu0 %v5148_v48  ;;  %v6212_v53 = vpop.permute.xlu0 %5580  ;;  %336 = vmatprep.mubr.f32.mxu0 %v7577_v13  ;;  %7618 = vst [vmem:[#allocation7_spill] sm:$0xff] %v6247_v51  ;;  %v5557_v48 = vunpack.i.l.bf16 %v6133_v44 }
  0x9f   :  { %v6226_v36 = vpop.permute.xlu1 %5585  ;;  %5179 = vmatpush3.bf16.msra.mxu1 %v5176_v4 }
  0xa0   :  { %5002 = vmatmul.mubr.msk.f32.gmra.mrb[2].mxu1 %vm67_vm0, %v6210_v52  ;;  %4651 = vmatmul.mubr.msk.f32.gmra.mrb[2].mxu0 %vm67_vm0, %v5871_v14  ;;  %v911_v43 = vsel %vm909_vm4, %v5557_v48, %v5507_v56 }
  0xa1   :  { %5008 = vmatprep.mubr.msk.f32.mxu1 %vm67_vm0, %v6218_v24  ;;  %342 = vmatprep.mubr.f32.mxu0 %v7577_v13 }
  0xa2   :  { %v6242_v4 = vpop.permute.xlu0 %5590  ;;  %5185 = vmatprep.subr.bf16.mxu1 %v5184_v33 }
  0xa3   :  { %v6249_v57 = vpop.permute.xlu1 %5595 }
  0xa4   :  { %5009 = vmatmul.mubr.msk.f32.vlgmr.msra.gmra.mrb[0].mxu1 %vm67_vm0, %v6238_v41  ;;  %4652 = vmatmul.mubr.msk.f32.gmra.mrb[4].mxu0 %vm67_vm0, %v5876_v15 }
  0xa5   :  { %5011 = vmatprep.mubr.msk.f32.mxu1 %vm67_vm0, %v6247_v51  ;;  %348 = vmatprep.mubr.f32.mxu0 %v7577_v13 }
  0xa6   :  { %v6275_v38 = vpop.permute.xlu0 %5600  ;;  %5187 = vmatpush3.bf16.msra.mxu1 %v5184_v33  ;;  %v913_v33 = vsel %vm909_vm4, %v7576_v28, %v5508_v55  ;;  %v6324_v55 = vld [vmem:[%s7562_s1 + $0xf8] sm:$0xff] }
  0xa7   :  { %v6282_v11 = vpop.permute.xlu1 %5605  ;;  %5193 = vmatprep.subr.bf16.mxu1 %v5192_v60  ;;  %v5156_v54 = vpack.c.bf16 %v913_v33, %v911_v43  ;;  %7623 = vst [vmem:[#allocation12_spill] sm:$0xff] %v6324_v55  ;;  %v6350_v33 = vld [vmem:[%s7562_s1 + $0x108] sm:$0xff] }
  0xa8   :  { %5012 = vmatmul.mubr.msk.f32.gmra.mrb[2].mxu1 %vm67_vm0, %v6267_v63  ;;  %4653 = vmatmul.mubr.msk.f32.gmra.mrb[6].mxu0 %vm67_vm0, %v5892_v18  ;;  %7625 = vst [vmem:[#allocation14_spill] sm:$0xff] %v6350_v33  ;;  %v7632_v63 = vunpack.i.h.bf16 %v6103_v31 }
  0xa9   :  { %5018 = vmatprep.mubr.msk.f32.mxu1 %vm67_vm0, %v6280_v9  ;;  %544 = vmatprep.mubr.f32.mxu0 %v7577_v13 }
  0xaa   :  { %v6306_v34 = vpop.permute.xlu0 %5610 }
  0xab   :  { %v6313_v1 = vpop.permute.xlu1 %5615 }
  0xac   :  { %5019 = vmatmul.mubr.msk.f32.vlgmr.msra.gmra.mrb[0].mxu1 %vm67_vm0, %v6294_v21  ;;  %4662 = vmatmul.mubr.msk.f32.vlgmr.msra.gmra.mrb[0].mxu0 %vm67_vm0, %v5897_v19 }
  0xad   :  { %5151 = vmatpush1.bf16.msra.mxu0 %v5150_v42  ;;  %5021 = vmatprep.mubr.msk.f32.mxu1 %vm67_vm0, %v6311_v37  ;;  %v5200_v42 = vpack.c.bf16 %v7574_v46, %v7575_v47  ;;  %v6359_v47 = vld [vmem:[%s7562_s1 + $0x110] sm:$0xff] }
  0xae   :  { %5157 = vmatprep.subr.bf16.mxu0 %v5156_v54  ;;  %v6326_v56 = vpop.permute.xlu0 %5620  ;;  %550 = vmatprep.mubr.f32.mxu0 %v7577_v13  ;;  %v5563_v54 = vunpack.i.h.bf16 %v6153_v49  ;;  %7626 = vst [vmem:[#allocation15_spill] sm:$0xff] %v6359_v47 }
  0xaf   :  { %v6338_v43 = vpop.permute.xlu1 %5625  ;;  %5195 = vmatpush3.bf16.msra.mxu1 %v5192_v60  ;;  %v5562_v60 = vunpack.i.l.bf16 %v6153_v49  ;;  %v5573_v49 = vunpack.i.h.bf16 %v6192_v7  ;;  %v7630_v7 = vunpack.i.l.bf16 %v6103_v31 }
  0xb0   :  { %5022 = vmatmul.mubr.msk.f32.gmra.mrb[2].mxu1 %vm67_vm0, %v6324_v55  ;;  %4663 = vmatmul.mubr.msk.f32.gmra.mrb[2].mxu0 %vm67_vm0, %v5994_v58  ;;  %v7627_v55 = vmov 0.0  }
  0xb1   :  { %5028 = vmatprep.mubr.msk.f32.mxu1 %vm67_vm0, %v6332_v35  ;;  %556 = vmatprep.mubr.f32.mxu0 %v7577_v13  ;;  %v6377_v13 = vld [vmem:[%s7562_s1 + $0x118] sm:$0xff]  ;;  %v910_v35 = vsel %vm909_vm4, %v5562_v60, %v5557_v48  ;;  %v7600_v60 = vunpack.i.l.bf16 %v6166_v17 }
  0xb2   :  { %v6354_v46 = vpop.permute.xlu0 %5630  ;;  %5201 = vmatprep.subr.bf16.mxu1 %v5200_v42  ;;  %7628 = vst [vmem:[#allocation16_spill] sm:$0xff] %v6377_v13 }
  0xb3   :  { %v6361_v28 = vpop.permute.xlu1 %5635 }
  0xb4   :  { %5029 = vmatmul.mubr.msk.f32.vlgmr.msra.gmra.mrb[0].mxu1 %vm67_vm0, %v6350_v33  ;;  %4664 = vmatmul.mubr.msk.f32.gmra.mrb[4].mxu0 %vm67_vm0, %v6010_v62  ;;  %v7629_v33 = vunpack.i.h.bf16 %v6133_v44  ;;  %v7633_v51 = vunpack.i.h.bf16 %v6361_v28 }
  0xb5   :  { %5031 = vmatprep.mubr.msk.f32.mxu1 %vm67_vm0, %v6359_v47  ;;  %562 = vmatprep.mubr.f32.mxu0 %v7627_v55  ;;  %v7631_v47 = vunpack.i.l.bf16 %v6361_v28 }
  0xb6   :  { %v912_v37 = vsel %vm909_vm4, %v5563_v54, %v7629_v33  ;;  %v6383_v21 = vpop.permute.xlu0 %5640  ;;  %5203 = vmatpush3.bf16.msra.mxu1 %v5200_v42  ;;  %v6397_v48 = vsel %vm1813_vm5, %v7633_v51, %v7632_v63  ;;  %v7634_v63 = vunpack.i.l.bf16 %v6005_v61  ;;  %v7599_v54 = vunpack.i.h.bf16 %v6166_v17 }
  0xb7   :  { %v6390_v9 = vsel %vm1813_vm5, %v7631_v47, %v7630_v7  ;;  %v6399_v44 = vpop.permute.xlu1 %5645  ;;  %5209 = vmatprep.subr.bf16.mxu1 %v5949_v30  ;;  %v5158_v31 = vpack.c.bf16 %v912_v37, %v910_v35  ;;  %v7635_v47 = vunpack.i.h.bf16 %v6005_v61 }
  0xb8   :  { %5032 = vmatmul.mubr.msk.f32.gmra.mrb[2].mxu1 %vm67_vm0, %v6377_v13  ;;  %4665 = vmatmul.mubr.msk.f32.gmra.mrb[6].mxu0 %vm67_vm0, %v6027_v3  ;;  %v1137_v51 = vsel %vm1135_vm6, %v5572_v25, %v7634_v63  ;;  %v5216_v37 = vpack.c.bf16 %v7599_v54, %v7600_v60  ;;  %v7636_v54 = vunpack.i.l.bf16 %v6126_v39 }
  0xb9   :  { %5038 = vmatprep.mubr.msk.f32.mxu1 %vm67_vm0, %v5999_v59  ;;  %770 = vmatprep.mubr.f32.mxu0 %v7627_v55  ;;  %v1139_v33 = vsel %vm1135_vm6, %v5573_v49, %v7635_v47  ;;  %v7605_v47 = vunpack.i.l.bf16 %v6212_v53  ;;  %v7641_v59 = vunpack.i.l.bf16 %v6166_v17 }
  0xba   :  { %v6419_v7 = vpop.permute.xlu0 %5650  ;;  %v5164_v35 = vpack.c.bf16 %v1139_v33, %v1137_v51 }
  0xbb   :  { %v6421_v42 = vpop.permute.xlu1 %5655 }
  0xbc   :  { %5039 = vmatmul.mubr.msk.f32.vlgmr.msra.gmra.mrb[4].mxu1 %vm67_vm0, %v6032_v6  ;;  %4674 = vmatmul.mubr.msk.f32.vlgmr.msra.gmra.mrb[0].mxu0 %vm67_vm0, %v6038_v8 }
  0xbd   :  { %5159 = vmatpush1.bf16.msra.mxu0 %v5158_v31  ;;  %5041 = vmatprep.mubr.msk.f32.mxu1 %vm67_vm0, %v6062_v0  ;;  %v5577_v0 = vunpack.i.l.bf16 %v6199_v23 }
  0xbe   :  { %5165 = vmatprep.subr.bf16.mxu0 %v5164_v35  ;;  %v6429_v61 = vpop.permute.xlu0 %5660  ;;  %776 = vmatprep.mubr.f32.mxu0 %v7627_v55  ;;  %v5578_v35 = vunpack.i.h.bf16 %v6199_v23  ;;  %v7637_v23 = vunpack.i.h.bf16 %v6126_v39 }
  0xbf   :  { %v7604_v51 = vunpack.i.h.bf16 %v6429_v61  ;;  %v7603_v31 = vunpack.i.l.bf16 %v6429_v61  ;;  %v6440_v33 = vpop.permute.xlu1 %5665  ;;  %5211 = vmatpush3.bf16.msra.mxu1 %v5949_v30 }
  0xc0   :  { %5042 = vmatmul.mubr.msk.f32.gmra.mrb[6].mxu1 %vm67_vm0, %v6094_v27  ;;  %4675 = vmatmul.mubr.msk.f32.gmra.mrb[2].mxu0 %vm67_vm0, %v6057_v20  ;;  %v7638_v27 = vunpack.i.h.bf16 %v6212_v53  ;;  %v1138_v39 = vsel %vm1135_vm6, %v5578_v35, %v5573_v49 }
  0xc1   :  { %5048 = vmatprep.mubr.msk.f32.mxu1 %vm67_vm0, %v5855_v10  ;;  %782 = vmatprep.mubr.f32.mxu0 %v7627_v55  ;;  %v6457_v30 = vsel %vm56_vm1, %v7603_v31, %v7636_v54  ;;  %v6464_v60 = vsel %vm56_vm1, %v7604_v51, %v7637_v23  ;;  %v1136_v31 = vsel %vm1135_vm6, %v5577_v0, %v5572_v25  ;;  %v5588_v23 = vunpack.i.h.bf16 %v6226_v36 }
  0xc2   :  { %v6466_v63 = vpop.permute.xlu0 %5670  ;;  %5217 = vmatprep.subr.bf16.mxu1 %v5216_v37  ;;  %v5224_v6 = vpack.c.bf16 %v7638_v27, %v7605_v47  ;;  %v5587_v51 = vunpack.i.l.bf16 %v6226_v36  ;;  %v7610_v10 = vunpack.i.h.bf16 %v6275_v38  ;;  %v7609_v27 = vunpack.i.l.bf16 %v6275_v38 }
  0xc3   :  { %v6474_v54 = vpop.permute.xlu1 %5675  ;;  %v5593_v25 = vunpack.i.h.bf16 %v6242_v4  ;;  %v7640_v36 = vunpack.i.h.bf16 %v6042_v12 }
  0xc4   :  { %5049 = vmatmul.mubr.msk.f32.vlgmr.msra.gmra.mrb[4].mxu1 %vm67_vm0, %v5871_v14  ;;  %4676 = vmatmul.mubr.msk.f32.gmra.mrb[4].mxu0 %vm67_vm0, %v6069_v16  ;;  %v5592_v14 = vunpack.i.l.bf16 %v6242_v4  ;;  %v5598_v4 = vunpack.i.h.bf16 %v6249_v57 }
  0xc5   :  { %5051 = vmatprep.mubr.msk.f32.mxu1 %vm67_vm0, %v5876_v15  ;;  %788 = vmatprep.mubr.f32.mxu0 %v7627_v55  ;;  %v5166_v15 = vpack.c.bf16 %v1138_v39, %v1136_v31  ;;  %v2883_v31 = vsel %vm909_vm4, %v5587_v51, %v5588_v23  ;;  %v5597_v39 = vunpack.i.l.bf16 %v6249_v57 }
  0xc6   :  { %v6491_v0 = vpop.permute.xlu0 %5680  ;;  %5219 = vmatpush3.bf16.msra.mxu1 %v5216_v37  ;;  %v7639_v37 = vunpack.i.l.bf16 %v6042_v12  ;;  %v7643_v12 = vunpack.i.h.bf16 %v6166_v17 }
  0xc7   :  { %v6493_v49 = vpop.permute.xlu1 %5685  ;;  %5225 = vmatprep.subr.bf16.mxu1 %v5224_v6  ;;  %v2882_v17 = vsel %vm909_vm4, %v5597_v39, %v5587_v51  ;;  %v5607_v51 = vunpack.i.l.bf16 %v6282_v11 }
  0xc8   :  { %5052 = vmatmul.mubr.msk.f32.gmra.mrb[6].mxu1 %vm67_vm0, %v5892_v18  ;;  %4677 = vmatmul.mubr.msk.f32.gmra.mrb[6].mxu0 %vm67_vm0, %v6089_v26  ;;  %v1363_v47 = vsel %vm1361_vm7, %v7609_v27, %v7639_v37  ;;  %v1365_v18 = vsel %vm1361_vm7, %v7610_v10, %v7640_v36  ;;  %v7642_v13 = vunpack.i.l.bf16 %v6493_v49  ;;  %v7644_v27 = vunpack.i.h.bf16 %v6493_v49 }
  0xc9   :  { %5058 = vmatprep.mubr.msk.f32.mxu1 %vm67_vm0, %v5897_v19  ;;  %996 = vmatprep.mubr.f32.mxu0 %v7627_v55  ;;  %v2885_v19 = vsel %vm909_vm4, %v5592_v14, %v5593_v25  ;;  %v5172_v10 = vpack.c.bf16 %v1365_v18, %v1363_v47  ;;  %v5608_v47 = vunpack.i.h.bf16 %v6282_v11  ;;  %v5613_v11 = vunpack.i.h.bf16 %v6306_v34 }
  0xca   :  { %v6517_v35 = vpop.permute.xlu0 %5690  ;;  %v6525_v37 = vsel %vm457_vm2, %v7642_v13, %v7641_v59  ;;  %v6532_v36 = vsel %vm457_vm2, %v7644_v27, %v7643_v12  ;;  %v5228_v13 = vpack.c.bf16 %v2885_v19, %v2883_v31  ;;  %v2884_v59 = vsel %vm909_vm4, %v5598_v4, %v5592_v14 }
  0xcb   :  { %v5212_v57 = vpack.c.bf16 %v6532_v36, %v6525_v37  ;;  %v5623_v14 = vunpack.i.h.bf16 %v6326_v56  ;;  %v7649_v12 = vunpack.i.l.bf16 %v6064_v5  ;;  %v5693_v37 = vunpack.i.h.bf16 %v6517_v35 }
  0xcc   :  { %5059 = vmatmul.mubr.msk.f32.vlgmr.msra.gmra.mrb[4].mxu1 %vm67_vm0, %v5994_v58  ;;  %4686 = vmatmul.mubr.msk.f32.vlgmr.msra.gmra.mrb[0].mxu0 %vm67_vm0, %v6101_v29  ;;  %v5230_v58 = vpack.c.bf16 %v2884_v59, %v2882_v17  ;;  %v7650_v59 = vunpack.i.h.bf16 %v6064_v5  ;;  %v5618_v5 = vunpack.i.h.bf16 %v6313_v1  ;;  %v5692_v36 = vunpack.i.l.bf16 %v6517_v35 }
  0xcd   :  { %5167 = vmatpush1.bf16.msra.mxu0 %v5166_v15  ;;  %5061 = vmatprep.mubr.msk.f32.mxu1 %vm67_vm0, %v6010_v62  ;;  %v5232_v62 = vpack.c.bf16 %v5593_v25, %v5588_v23  ;;  %v5622_v15 = vunpack.i.l.bf16 %v6326_v56  ;;  %v5627_v23 = vunpack.i.l.bf16 %v6338_v43  ;;  %v5612_v25 = vunpack.i.l.bf16 %v6306_v34 }
  0xce   :  { %5173 = vmatprep.subr.bf16.mxu0 %v5172_v10  ;;  %v6544_v27 = vpop.permute.xlu0 %5700  ;;  %1002 = vmatprep.mubr.f32.mxu0 %v7627_v55  ;;  %v7645_v56 = vunpack.i.l.bf16 %v6212_v53  ;;  %v7647_v34 = vunpack.i.h.bf16 %v6275_v38  ;;  %v1591_v17 = vsel %vm1587_vm8, %v5613_v11, %v7650_v59 }
  0xcf   :  { %5227 = vmatpush3.bf16.msra.mxu1 %v5224_v6  ;;  %v3091_v39 = vsel %vm1135_vm6, %v5622_v15, %v5623_v14 }
  0xd0   :  { %5062 = vmatmul.mubr.msk.f32.gmra.mrb[6].mxu1 %vm67_vm0, %v6027_v3  ;;  %4687 = vmatmul.mubr.msk.f32.gmra.mrb[2].mxu0 %vm67_vm0, %v6116_v32  ;;  %v1364_v18 = vsel %vm1361_vm7, %v5608_v47, %v7647_v34 }
  0xd1   :  { %5068 = vmatprep.mubr.msk.f32.mxu1 %vm67_vm0, %v6038_v8  ;;  %5229 = vmatprep.subr.bf16.mxu1 %v5228_v13  ;;  %v5628_v8 = vunpack.i.h.bf16 %v6338_v43  ;;  %v1589_v13 = vsel %vm1587_vm8, %v5612_v25, %v7649_v12  ;;  %v7656_v12 = vld [vmem:[#allocation9_spill] sm:$0xff] }
  0xd2   :  { %v6555_v10 = vpop.permute.xlu0 %5710  ;;  %1008 = vmatprep.mubr.f32.mxu0 %v7627_v55  ;;  %v5180_v47 = vpack.c.bf16 %v1591_v17, %v1589_v13  ;;  %v7657_v17 = vpack.c.bf16 %v6464_v60, %v6457_v30  ;;  %v5667_v60 = vunpack.i.l.bf16 %v6440_v33  ;;  %v5673_v30 = vunpack.i.h.bf16 %v6466_v63 }
  0xd3   :  { %v5713_v6 = vunpack.i.h.bf16 %v6555_v10  ;;  %v5712_v3 = vunpack.i.l.bf16 %v6555_v10  ;;  %v3093_v19 = vsel %vm1135_vm6, %v5627_v23, %v5628_v8  ;;  %v5766_v10 = vld [vmem:[%s7562_s1 + $0x40] sm:$0xff] }
  0xd4   :  { %5069 = vmatmul.mubr.msk.f32.vlgmr.msra.gmra.mrb[4].mxu1 %vm67_vm0, %v6057_v20  ;;  %4688 = vmatmul.mubr.msk.f32.gmra.mrb[4].mxu0 %vm67_vm0, %v6131_v40  ;;  %v7646_v20 = vunpack.i.h.bf16 %v6212_v53 }
  0xd5   :  { %5231 = vmatpush1.bf16.msra.mxu1 %v5230_v58  ;;  %5071 = vmatprep.mubr.msk.f32.mxu1 %vm67_vm0, %v6069_v16  ;;  %v6577_v43 = vsel %vm683_vm3, %v5712_v3, %v7645_v56  ;;  %v7648_v16 = vunpack.i.l.bf16 %v6275_v38  ;;  %v5236_v58 = vpack.c.bf16 %v3093_v19, %v3091_v39  ;;  %v5632_v56 = vunpack.i.l.bf16 %v6354_v46 }
  0xd6   :  { %v6584_v4 = vsel %vm683_vm3, %v5713_v6, %v7646_v20  ;;  %5233 = vmatprep.subr.bf16.mxu1 %v5232_v62  ;;  %1014 = vmatprep.mubr.f32.mxu0 %v7627_v55  ;;  %v1590_v20 = vsel %vm1587_vm8, %v5618_v5, %v5613_v11  ;;  %v5240_v11 = vpack.c.bf16 %v5628_v8, %v5623_v14  ;;  %v7654_v8 = vunpack.i.h.bf16 %v6361_v28 }
  0xd7   :  { %v1362_v31 = vsel %vm1361_vm7, %v5607_v51, %v7648_v16  ;;  %v5220_v53 = vpack.c.bf16 %v6584_v4, %v6577_v43  ;;  %v5633_v51 = vunpack.i.h.bf16 %v6354_v46  ;;  %v5668_v5 = vunpack.i.h.bf16 %v6440_v33 }
  0xd8   :  { %5072 = vmatmul.mubr.msk.f32.gmra.mrb[6].mxu1 %vm67_vm0, %v6089_v26  ;;  %4689 = vmatmul.mubr.msk.f32.gmra.mrb[6].mxu0 %vm67_vm0, %v6149_v45  ;;  %v5174_v38 = vpack.c.bf16 %v1364_v18, %v1362_v31  ;;  %v5652_v31 = vunpack.i.l.bf16 %v6419_v7  ;;  %v7660_v33 = vunpack.i.h.bf16 %v6429_v61 }
  0xd9   :  { %2956 = vmatprep.mubr.f32.mxu1 %v7627_v55  ;;  %1222 = vmatprep.mubr.f32.mxu0 %v7627_v55  ;;  %v3092_v18 = vsel %vm1135_vm6, %v5633_v51, %v5627_v23  ;;  %v5653_v23 = vunpack.i.h.bf16 %v6419_v7  ;;  %v5678_v51 = vunpack.i.h.bf16 %v6474_v54 }
  0xdb   :  { %v3301_v7 = vsel %vm1361_vm7, %v5652_v31, %v5653_v23 }
  0xdc   :  { %4780 = vmatmul.mubr.msk.f32.vlgmr.msra.gmra.mrb[8].mxu1 %vm67_vm0, %v6101_v29  ;;  %4698 = vmatmul.mubr.msk.f32.vlgmr.msra.gmra.mrb[0].mxu0 %vm67_vm0, %v6160_v2 }
  0xdd   :  { %5235 = vmatpush3.bf16.msra.mxu1 %v5232_v62  ;;  %5175 = vmatpush1.bf16.msra.mxu0 %v5174_v38  ;;  %v5617_v62 = vunpack.i.l.bf16 %v6313_v1  ;;  %v3090_v1 = vsel %vm1135_vm6, %v5632_v56, %v5622_v15  ;;  %v5647_v15 = vunpack.i.l.bf16 %v6399_v44  ;;  %v5658_v38 = vunpack.i.h.bf16 %v6421_v42 }
  0xde   :  { %5181 = vmatprep.subr.bf16.mxu0 %v5180_v47  ;;  %2962 = vmatprep.mubr.f32.mxu1 %v7627_v55  ;;  %v5238_v46 = vpack.c.bf16 %v3092_v18, %v3090_v1  ;;  %v5677_v56 = vunpack.i.l.bf16 %v6474_v54  ;;  %v5759_v18 = vld [vmem:[%s7561_s0 + $0x38] sm:$0xff] }
  0xdf   :  { %1228 = vmatprep.mubr.f32.mxu0 %v7627_v55  ;;  %5237 = vmatprep.subr.bf16.mxu1 %v5236_v58  ;;  %v1588_v34 = vsel %vm1587_vm8, %v5617_v62, %v5612_v25  ;;  %v5648_v25 = vunpack.i.h.bf16 %v6399_v44  ;;  %v3300_v13 = vsel %vm1361_vm7, %v5658_v38, %v5652_v31  ;;  %v5672_v62 = vunpack.i.l.bf16 %v6466_v63 }
  0xe0   :  { %4781 = vmatmul.mubr.msk.f32.gmra.mrb[10].mxu1 %vm67_vm0, %v6116_v32  ;;  %4699 = vmatmul.mubr.msk.f32.gmra.mrb[2].mxu0 %vm67_vm0, %v6178_v50  ;;  %v5182_v16 = vpack.c.bf16 %v1590_v20, %v1588_v34  ;;  %v2098_v20 = vsel %vm56_vm1, %v5668_v5, %v7660_v33  ;;  %v7661_v63 = vunpack.i.l.bf16 %v6429_v61  ;;  %v5764_v33 = vld [vmem:[%s7562_s1 + $0x10] sm:$0xff] }
  0xe1   :  { %2968 = vmatprep.mubr.f32.mxu1 %v7627_v55  ;;  %1234 = vmatprep.mubr.f32.mxu0 %v7627_v55  ;;  %v3299_v44 = vsel %vm1361_vm7, %v5647_v15, %v5648_v25  ;;  %v5248_v47 = vpack.c.bf16 %v5653_v23, %v5648_v25  ;;  %v3507_v54 = vsel %vm1587_vm8, %v5672_v62, %v5673_v30  ;;  %v5683_v25 = vunpack.i.h.bf16 %v6491_v0  ;;  %v7666_v23 = vld [vmem:[#allocation15_spill] sm:$0xff] }
  0xe2   :  { %v2096_v34 = vsel %vm56_vm1, %v5667_v60, %v7661_v63  ;;  %v5769_v63 = vld [vmem:[%s7562_s1 + $0x58] sm:$0xff]  ;;  %vm4401_vm1 = vcmask 31744  }
  0xe3   :  { %v5198_v61 = vpack.c.bf16 %v2098_v20, %v2096_v34  ;;  %v5770_v34 = vld [vmem:[%s7562_s1 + $0x60] sm:$0xff] }
  0xe4   :  { %4782 = vmatmul.mubr.msk.f32.gmra.mrb[12].mxu1 %vm67_vm0, %v6131_v40  ;;  %4700 = vmatmul.mubr.msk.f32.gmra.mrb[4].mxu0 %vm67_vm0, %v6197_v22 }
  0xe5   :  { %2974 = vmatprep.mubr.f32.mxu1 %v7627_v55  ;;  %1240 = vmatprep.mubr.f32.mxu0 %v7627_v55 }
  0xe8   :  { %4783 = vmatmul.mubr.msk.f32.gmra.mrb[14].mxu1 %vm67_vm0, %v6149_v45  ;;  %4701 = vmatmul.mubr.msk.f32.gmra.mrb[6].mxu0 %vm67_vm0, %v6210_v52 }
  0xe9   :  { %5078 = vmatprep.mubr.msk.f32.mxu1 %vm67_vm0, %v6101_v29  ;;  %1448 = vmatprep.mubr.f32.mxu0 %v7627_v55  ;;  %v7651_v29 = vpack.c.bf16 %v6397_v48, %v6390_v9  ;;  %v5643_v9 = vunpack.i.h.bf16 %v6383_v21  ;;  %v7652_v48 = vld [vmem:[#allocation7_spill] sm:$0xff] }
  0xeb   :  { %v1816_v39 = vsel %vm1813_vm5, %v5643_v9, %v7654_v8  ;;  %v5761_v9 = vld [vmem:[%s7561_s0 + $0x48] sm:$0xff]  ;;  %v5702_v8 = vunpack.i.l.bf16 %v6544_v27 }
  0xec   :  { %5079 = vmatmul.mubr.msk.f32.vlgmr.msra.gmra.mrb[4].mxu1 %vm67_vm0, %v6116_v32  ;;  %4710 = vmatmul.mubr.msk.f32.vlgmr.msra.gmra.mrb[0].mxu0 %vm67_vm0, %v6218_v24  ;;  %v5642_v32 = vunpack.i.l.bf16 %v6383_v21  ;;  %v7655_v21 = vld [vmem:[#allocation8_spill] sm:$0xff] }
  0xed   :  { %5239 = vmatpush1.bf16.msra.mxu1 %v5238_v46  ;;  %5183 = vmatpush1.bf16.msra.mxu0 %v5182_v16  ;;  %v7663_v46 = vld [vmem:[#allocation2_spill] sm:$0xff] }
  0xee   :  { %5241 = vmatprep.subr.bf16.mxu1 %v5240_v11  ;;  %5189 = vmatprep.subr.bf16.mxu0 %v7651_v29  ;;  %v5204_v16 = vpack.c.bf16 %v7663_v46, %v5759_v18  ;;  %v3508_v29 = vsel %vm1587_vm8, %v5683_v25, %v5677_v56 }
  0xef   :  { %5081 = vmatprep.mubr.msk.f32.mxu1 %vm67_vm0, %v6131_v40  ;;  %1454 = vmatprep.mubr.f32.mxu0 %v7627_v55  ;;  %v5244_v40 = vpack.c.bf16 %v3301_v7, %v3299_v44  ;;  %v7667_v44 = vld [vmem:[#allocation16_spill] sm:$0xff] }
  0xf0   :  { %5082 = vmatmul.mubr.msk.f32.gmra.mrb[6].mxu1 %vm67_vm0, %v6149_v45  ;;  %4711 = vmatmul.mubr.msk.f32.gmra.mrb[2].mxu0 %vm67_vm0, %v6238_v41  ;;  %v7653_v45 = vunpack.i.l.bf16 %v6361_v28  ;;  %v5657_v28 = vunpack.i.l.bf16 %v6421_v42  ;;  %v7658_v42 = vld [vmem:[#allocation10_spill] sm:$0xff]  ;;  %v5760_v7 = vld [vmem:[%s7561_s0 + $0x30] sm:$0xff]  ;;  %s5783_s0 = smov 1  }
  0xf1   :  { %3164 = vmatprep.mubr.f32.mxu1 %v7627_v55  ;;  %1460 = vmatprep.mubr.f32.mxu0 %v7627_v55 }
  0xf2   :  { %v1814_v14 = vsel %vm1813_vm5, %v5642_v32, %v7653_v45  ;;  %v3298_v59 = vsel %vm1361_vm7, %v5657_v28, %v5647_v15  ;;  %v5682_v15 = vunpack.i.l.bf16 %v6491_v0  ;;  %v5206_v32 = vpack.c.bf16 %v5761_v9, %v5760_v7  ;;  %v5696_v45 = vpop.permute.xlu1 %5695 }
  0xf3   :  { %v5190_v19 = vpack.c.bf16 %v1816_v39, %v1814_v14  ;;  %v5246_v58 = vpack.c.bf16 %v3300_v13, %v3298_v59  ;;  %v5703_v14 = vunpack.i.h.bf16 %v6544_v27  ;;  %v5698_v39 = vunpack.i.h.bf16 %v5696_v45 }
  0xf4   :  { %4788 = vmatmul.mubr.msk.f32.vlgmr.msra.gmra.mrb[8].mxu1 %vm67_vm0, %v6160_v2  ;;  %4712 = vmatmul.mubr.msk.f32.gmra.mrb[4].mxu0 %vm67_vm0, %v7652_v48  ;;  %v3506_v31 = vsel %vm1587_vm8, %v5682_v15, %v5672_v62  ;;  %v7672_v13 = vunpack.i.h.bf16 %v6493_v49 }
  0xf5   :  { %5243 = vmatpush3.bf16.msra.mxu1 %v5240_v11  ;;  %3170 = vmatprep.mubr.f32.mxu1 %v7627_v55  ;;  %v7665_v11 = vld [vmem:[#allocation14_spill] sm:$0xff]  ;;  %v5254_v0 = vpack.c.bf16 %v3508_v29, %v3506_v31  ;;  %v3717_v38 = vsel %vm1813_vm5, %v5702_v8, %v5703_v14  ;;  %v5264_v43 = vpack.c.bf16 %v5703_v14, %v5698_v39 }
  0xf6   :  { %1466 = vmatprep.mubr.f32.mxu0 %v7627_v55  ;;  %5245 = vmatprep.subr.bf16.mxu1 %v5244_v40  ;;  %v5256_v40 = vpack.c.bf16 %v5678_v51, %v5673_v30  ;;  %v2468_v59 = vsel %vm457_vm2, %v5693_v37, %v7672_v13  ;;  %v5706_v35 = vpop.permute.xlu1 %5705 }
  0xf7   :  { %v5707_v5 = vunpack.i.l.bf16 %v5706_v35 }
  0xf8   :  { %4789 = vmatmul.mubr.msk.f32.gmra.mrb[10].mxu1 %vm67_vm0, %v6178_v50  ;;  %4713 = vmatmul.mubr.msk.f32.gmra.mrb[6].mxu0 %vm67_vm0, %v7655_v21 }
  0xf9   :  { %3176 = vmatprep.mubr.f32.mxu1 %v7627_v55  ;;  %1674 = vmatprep.mubr.f32.mxu0 %v7627_v55 }
  0xfa   :  { %v5716_v62 = vpop.permute.xlu1 %5715 }
  0xfb   :  { %v5718_v4 = vunpack.i.h.bf16 %v5716_v62 }
  0xfc   :  { %4790 = vmatmul.mubr.msk.f32.gmra.mrb[12].mxu1 %vm67_vm0, %v6197_v22  ;;  %4722 = vmatmul.mubr.msk.f32.vlgmr.msra.gmra.mrb[0].mxu0 %vm67_vm0, %v7656_v12 }
  0xfd   :  { %5191 = vmatpush1.bf16.msra.mxu0 %v5190_v19  ;;  %3182 = vmatprep.mubr.f32.mxu1 %v7627_v55  ;;  %v5697_v19 = vunpack.i.l.bf16 %v5696_v45 }
  0xfe   :  { %5197 = vmatprep.subr.bf16.mxu0 %v7657_v17  ;;  %1680 = vmatprep.mubr.f32.mxu0 %v7627_v55  ;;  %v7673_v17 = vld [vmem:[#allocation6_spill] sm:$0xff] }
  0xff   :  { %v3715_v27 = vsel %vm1813_vm5, %v5697_v19, %v5698_v39  ;;  %v3714_v30 = vsel %vm1813_vm5, %v5707_v5, %v5697_v19 }
 0x100   :  { %4791 = vmatmul.mubr.msk.f32.gmra.mrb[14].mxu1 %vm67_vm0, %v6210_v52  ;;  %4723 = vmatmul.mubr.msk.f32.gmra.mrb[2].mxu0 %vm67_vm0, %v7658_v42 }
 0x101   :  { %5088 = vmatprep.mubr.msk.f32.mxu1 %vm67_vm0, %v6160_v2  ;;  %1686 = vmatprep.mubr.f32.mxu0 %v7627_v55  ;;  %v7659_v2 = vld [vmem:[#allocation11_spill] sm:$0xff] }
 0x104   :  { %5089 = vmatmul.mubr.msk.f32.vlgmr.msra.gmra.mrb[4].mxu1 %vm67_vm0, %v6178_v50  ;;  %4724 = vmatmul.mubr.msk.f32.gmra.mrb[4].mxu0 %vm67_vm0, %v7659_v2  ;;  %v7662_v50 = vld [vmem:[#allocation12_spill] sm:$0xff] }
 0x105   :  { %5247 = vmatpush1.bf16.msra.mxu1 %v5246_v58  ;;  %5091 = vmatprep.mubr.msk.f32.mxu1 %vm67_vm0, %v6197_v22  ;;  %v3509_v22 = vsel %vm1587_vm8, %v5677_v56, %v5678_v51  ;;  %v5763_v51 = vld [vmem:[%s7562_s1 + $0x8] sm:$0xff] }
 0x106   :  { %5249 = vmatprep.subr.bf16.mxu1 %v5248_v47  ;;  %1692 = vmatprep.mubr.f32.mxu0 %v7627_v55  ;;  %v5252_v1 = vpack.c.bf16 %v3509_v22, %v3507_v54  ;;  %v5772_v54 = vld [vmem:[%s7562_s1 + $0x70] sm:$0xff] }
 0x108   :  { %5092 = vmatmul.mubr.msk.f32.gmra.mrb[6].mxu1 %vm67_vm0, %v6210_v52  ;;  %4725 = vmatmul.mubr.msk.f32.gmra.mrb[6].mxu0 %vm67_vm0, %v7662_v50  ;;  %v7664_v52 = vld [vmem:[#allocation13_spill] sm:$0xff] }
 0x109   :  { %3372 = vmatprep.mubr.f32.mxu1 %v7627_v55  ;;  %1900 = vmatprep.mubr.f32.mxu0 %v7627_v55 }
 0x10c   :  { %4796 = vmatmul.mubr.msk.f32.vlgmr.msra.gmra.mrb[8].mxu1 %vm67_vm0, %v6218_v24  ;;  %4734 = vmatmul.mubr.msk.f32.vlgmr.msra.gmra.mrb[0].mxu0 %vm67_vm0, %v7664_v52 }
 0x10d   :  { %5251 = vmatpush3.bf16.msra.mxu1 %v5248_v47  ;;  %5199 = vmatpush1.bf16.msra.mxu0 %v5198_v61  ;;  %v5708_v47 = vunpack.i.h.bf16 %v5706_v35 }
 0x10e   :  { %3378 = vmatprep.mubr.f32.mxu1 %v7627_v55  ;;  %1906 = vmatprep.mubr.f32.mxu0 %v7627_v55 }
 0x10f   :  { %5253 = vmatprep.subr.bf16.mxu1 %v5252_v1  ;;  %5205 = vmatprep.subr.bf16.mxu0 %v5204_v16  ;;  %v3716_v60 = vsel %vm1813_vm5, %v5708_v47, %v5702_v8 }
 0x110   :  { %4797 = vmatmul.mubr.msk.f32.gmra.mrb[10].mxu1 %vm67_vm0, %v6238_v41  ;;  %4735 = vmatmul.mubr.msk.f32.gmra.mrb[2].mxu0 %vm67_vm0, %v7665_v11  ;;  %v5262_v56 = vpack.c.bf16 %v3716_v60, %v3714_v30 }
 0x111   :  { %3384 = vmatprep.mubr.f32.mxu1 %v7627_v55  ;;  %1912 = vmatprep.mubr.f32.mxu0 %v7627_v55 }
 0x114   :  { %4798 = vmatmul.mubr.msk.f32.gmra.mrb[12].mxu1 %vm67_vm0, %v7652_v48  ;;  %4736 = vmatmul.mubr.msk.f32.gmra.mrb[4].mxu0 %vm67_vm0, %v7666_v23 }
 0x115   :  { %3390 = vmatprep.mubr.f32.mxu1 %v7627_v55  ;;  %1918 = vmatprep.mubr.f32.mxu0 %v7627_v55 }
 0x118   :  { %4799 = vmatmul.mubr.msk.f32.gmra.mrb[14].mxu1 %vm67_vm0, %v7655_v21  ;;  %4737 = vmatmul.mubr.msk.f32.gmra.mrb[6].mxu0 %vm67_vm0, %v7667_v44 }
 0x119   :  { %5098 = vmatprep.mubr.msk.f32.mxu1 %vm67_vm0, %v6218_v24  ;;  %2170 = vmatprep.mubr.f32.mxu0 %v7627_v55  ;;  %v7668_v24 = vld [vmem:[#allocation3_spill] sm:$0xff] }
 0x11c   :  { %5099 = vmatmul.mubr.msk.f32.vlgmr.msra.gmra.mrb[4].mxu1 %vm67_vm0, %v6238_v41  ;;  %4748 = vmatmul.mubr.msk.f32.vlgmr.msra.gmra.mrb[12].mxu0 %vm67_vm0, %v7668_v24  ;;  %v7669_v41 = vld [vmem:[#allocation4_spill] sm:$0xff] }
 0x11d   :  { %5255 = vmatpush1.bf16.msra.mxu1 %v5254_v0  ;;  %5207 = vmatpush1.bf16.msra.mxu0 %v5206_v32  ;;  %v6926_v0 = vld [vmem:[%s7563_s3] sm:$0x7] }
 0x11e   :  { %5257 = vmatprep.subr.bf16.mxu1 %v5256_v40  ;;  %5213 = vmatprep.subr.bf16.mxu0 %v5212_v57  ;;  %v5260_v57 = vpack.c.bf16 %v3717_v38, %v3715_v27  ;;  %vm18_vm10 = vcmp.gt.f32.partialorder %v6926_v0, 0.5 }
 0x11f   :  { %5101 = vmatprep.mubr.msk.f32.mxu1 %vm67_vm0, %v7652_v48  ;;  %2176 = vmatprep.mubr.f32.mxu0 %v7627_v55  ;;  %v7670_v48 = vld [vmem:[#allocation5_spill] sm:$0xff] }
 0x120   :  { %5102 = vmatmul.mubr.msk.f32.gmra.mrb[6].mxu1 %vm67_vm0, %v7655_v21  ;;  %4749 = vmatmul.mubr.msk.f32.gmra.mrb[14].mxu0 %vm67_vm0, %v7669_v41  ;;  %v7671_v21 = vunpack.i.l.bf16 %v6493_v49  ;;  %v5762_v49 = vld [vmem:[%s7562_s1] sm:$0xff] }
 0x121   :  { %3580 = vmatprep.mubr.f32.mxu1 %v7627_v55  ;;  %2182 = vmatprep.mubr.f32.mxu0 %v7627_v55 }
 0x122   :  { %v2466_v28 = vsel %vm457_vm2, %v5692_v36, %v7671_v21  ;;  %vm4406_vm2 = vcmask 64512  }
 0x123   :  { %v5214_v58 = vpack.c.bf16 %v2468_v59, %v2466_v28 }
 0x124   :  { %4804 = vmatmul.mubr.msk.f32.vlgmr.msra.gmra.mrb[8].mxu1 %vm67_vm0, %v7656_v12  ;;  %4750 = vmatmul.mubr.msk.f32.gmra.mrb[16].mxu0 %vm67_vm0, %v7670_v48 }
 0x125   :  { %5259 = vmatpush3.bf16.msra.mxu1 %v5256_v40  ;;  %3586 = vmatprep.mubr.f32.mxu1 %v7627_v55 }
 0x126   :  { %2188 = vmatprep.mubr.f32.mxu0 %v7627_v55  ;;  %5261 = vmatprep.subr.bf16.mxu1 %v5260_v57 }
 0x128   :  { %4805 = vmatmul.mubr.msk.f32.gmra.mrb[10].mxu1 %vm67_vm0, %v7658_v42  ;;  %4751 = vmatmul.mubr.msk.f32.gmra.mrb[18].mxu0 %vm67_vm0, %v7673_v17 }
 0x129   :  { %3592 = vmatprep.mubr.f32.mxu1 %v7627_v55  ;;  %2344 = vmatprep.mubr.f32.mxu0 %v7627_v55 }
 0x12c   :  { %4806 = vmatmul.mubr.msk.f32.gmra.mrb[12].mxu1 %vm67_vm0, %v7659_v2  ;;  %4756 = vmatmul.mubr.msk.f32.vlgmr.msra.gmra.mrb[12].mxu0 %vm67_vm0, %v5762_v49 }
 0x12d   :  { %5215 = vmatpush1.bf16.msra.mxu0 %v5214_v58  ;;  %3598 = vmatprep.mubr.f32.mxu1 %v7627_v55 }
 0x12e   :  { %5221 = vmatprep.subr.bf16.mxu0 %v5220_v53  ;;  %2350 = vmatprep.mubr.f32.mxu0 %v7627_v55  ;;  %v5717_v53 = vunpack.i.l.bf16 %v5716_v62 }
 0x130   :  { %4807 = vmatmul.mubr.msk.f32.gmra.mrb[14].mxu1 %vm67_vm0, %v7662_v50  ;;  %4757 = vmatmul.mubr.msk.f32.gmra.mrb[14].mxu0 %vm67_vm0, %v5763_v51  ;;  %v2674_v20 = vsel %vm683_vm3, %v5717_v53, %v5712_v3  ;;  %v5768_v3 = vld [vmem:[%s7562_s1 + $0x50] sm:$0xff] }
 0x131   :  { %5108 = vmatprep.mubr.msk.f32.mxu1 %vm67_vm0, %v7656_v12  ;;  %2356 = vmatprep.mubr.f32.mxu0 %v7627_v55  ;;  %v2676_v12 = vsel %vm683_vm3, %v5718_v4, %v5713_v6  ;;  %v5767_v6 = vld [vmem:[%s7562_s1 + $0x48] sm:$0xff] }
 0x134   :  { %5109 = vmatmul.mubr.msk.f32.vlgmr.msra.gmra.mrb[4].mxu1 %vm67_vm0, %v7658_v42  ;;  %4758 = vmatmul.mubr.msk.f32.gmra.mrb[16].mxu0 %vm67_vm0, %v5764_v33  ;;  %v5765_v42 = vld [vmem:[%s7562_s1 + $0x18] sm:$0xff] }
 0x135   :  { %5263 = vmatpush1.bf16.msra.mxu1 %v5262_v56  ;;  %5111 = vmatprep.mubr.msk.f32.mxu1 %vm67_vm0, %v7659_v2  ;;  %v5222_v2 = vpack.c.bf16 %v2676_v12, %v2674_v20 }
 0x136   :  { %5265 = vmatprep.subr.bf16.mxu1 %v5264_v43  ;;  %2362 = vmatprep.mubr.f32.mxu0 %v7627_v55 }
 0x138   :  { %5112 = vmatmul.mubr.msk.f32.gmra.mrb[6].mxu1 %vm67_vm0, %v7662_v50  ;;  %4759 = vmatmul.mubr.msk.f32.gmra.mrb[18].mxu0 %vm67_vm0, %v5765_v42  ;;  %v5771_v50 = vld [vmem:[%s7562_s1 + $0x68] sm:$0xff] }
 0x139   :  { %3788 = vmatprep.mubr.f32.mxu1 %v7627_v55  ;;  %2540 = vmatprep.mubr.f32.mxu0 %v7627_v55 }
 0x13c   :  { %4812 = vmatmul.mubr.msk.f32.vlgmr.msra.gmra.mrb[8].mxu1 %vm67_vm0, %v7664_v52  ;;  %4764 = vmatmul.mubr.msk.f32.vlgmr.msra.gmra.mrb[12].mxu0 %vm67_vm0, %v5766_v10 }
 0x13d   :  { %5267 = vmatpush3.bf16.msra.mxu1 %v5264_v43  ;;  %5223 = vmatpush1.bf16.msra.mxu0 %v5222_v2 }
 0x13e   :  { %3794 = vmatprep.mubr.f32.mxu1 %v7627_v55  ;;  %2546 = vmatprep.mubr.f32.mxu0 %v7627_v55 }
 0x140   :  { %4813 = vmatmul.mubr.msk.f32.gmra.mrb[10].mxu1 %vm67_vm0, %v7665_v11  ;;  %4765 = vmatmul.mubr.msk.f32.gmra.mrb[14].mxu0 %vm67_vm0, %v5767_v6 }
 0x141   :  { %3800 = vmatprep.mubr.f32.mxu1 %v7627_v55  ;;  %2552 = vmatprep.mubr.f32.mxu0 %v7627_v55 }
 0x144   :  { %4814 = vmatmul.mubr.msk.f32.gmra.mrb[12].mxu1 %vm67_vm0, %v7666_v23  ;;  %4766 = vmatmul.mubr.msk.f32.gmra.mrb[16].mxu0 %vm67_vm0, %v5768_v3 }
 0x145   :  { %3806 = vmatprep.mubr.f32.mxu1 %v7627_v55  ;;  %2558 = vmatprep.mubr.f32.mxu0 %v7627_v55 }
 0x148   :  { %4815 = vmatmul.mubr.msk.f32.gmra.mrb[14].mxu1 %vm67_vm0, %v7667_v44  ;;  %4767 = vmatmul.mubr.msk.f32.gmra.mrb[18].mxu0 %vm67_vm0, %v5769_v63 }
 0x149   :  { %5118 = vmatprep.mubr.msk.f32.mxu1 %vm67_vm0, %v7664_v52  ;;  %2748 = vmatprep.mubr.f32.mxu0 %v7627_v55 }
 0x14c   :  { %5119 = vmatmul.mubr.msk.f32.vlgmr.msra.gmra.mrb[4].mxu1 %vm67_vm0, %v7665_v11  ;;  %4772 = vmatmul.mubr.msk.f32.vlgmr.msra.gmra.mrb[12].mxu0 %vm67_vm0, %v5770_v34 }
 0x14d   :  { %5121 = vmatprep.mubr.msk.f32.mxu1 %vm67_vm0, %v7666_v23  ;;  %2754 = vmatprep.mubr.f32.mxu0 %v7627_v55 }
 0x150   :  { %5122 = vmatmul.mubr.msk.f32.gmra.mrb[6].mxu1 %vm67_vm0, %v7667_v44  ;;  %4773 = vmatmul.mubr.msk.f32.gmra.mrb[14].mxu0 %vm67_vm0, %v5771_v50 }
 0x151   :  { %2760 = vmatprep.mubr.f32.mxu0 %v7627_v55 }
 0x154   :  { %4774 = vmatmul.mubr.msk.f32.gmra.mrb[16].mxu0 %vm67_vm0, %v5772_v54 }
 0x155   :  { %2766 = vmatprep.mubr.f32.mxu0 %v7627_v55  ;;  %v2023_v55 = vlaneseq }
 0x157   :  { %v6919_v29 = vshrl.u32 %v2023_v55, 7 }
 0x158   :  { %4775 = vmatmul.mubr.msk.f32.gmra.mrb[18].mxu0 %vm67_vm0, %v6089_v26  ;;  %vm4336_vm0 = vcmask 23552  }
 0x159   :  { %v2025_v26 = vsub.s32 0, %v6919_v29  ;;  %v7611_v44 = vsub.s32 2, %v6919_v29  ;;  %v7612_v7 = vsub.s32 1, %v6919_v29 }
 0x15b   :  { %v6932_v9 = vrot.slane %v6926_v0, %v2025_v26  ;;  %v6937_v32 = vrot.slane %v6926_v0, %v7611_v44  ;;  %v6942_v40 = vrot.slane %v6926_v0, %v7612_v7 }
 0x167   :  { %v4950_v22 = vpop.f32.mrb[8].mxu0 }
 0x168   :  { %v235_v61 = vpop.f32.mrb[9].mxu0 }
 0x16b   :  { %v4953_v1 = vpop.f32.mrb[10].mxu0 }
 0x16c   :  { %v245_v18 = vpop.f32.mrb[11].mxu0 }
 0x187   :  { %v5030_v46 = vpop.f32.mrb[0].mxu1 }
 0x188   :  { %v6911_v16 = vadd.f32 %v5030_v46, %v4950_v22  ;;  %v1991_v52 = vpop.f32.mrb[1].mxu1 }
 0x189   :  { %v6913_v11 = vadd.f32 %v1991_v52, %v235_v61 }
 0x18a   :  { %v2043_v36 = vmul.f32 %v6911_v16, %v6937_v32 }
 0x18b   :  { %v5033_v25 = vpop.f32.mrb[2].mxu1  ;;  %v2040_v39 = vmul.f32 %v6913_v11, %v6937_v32 }
 0x18c   :  { %v6915_v15 = vadd.f32 %v5033_v25, %v4953_v1  ;;  %v2001_v23 = vpop.f32.mrb[3].mxu1  ;;  %v2057_v35 = vsel %vm2051_vm9, %v2043_v36, 0.0 }
 0x18d   :  { %v6917_v31 = vadd.f32 %v2001_v23, %v245_v18  ;;  %v2052_v37 = vsel %vm2051_vm9, %v2040_v39, 0.0 }
 0x18e   :  { %v2049_v51 = vmul.f32 %v6915_v15, %v6937_v32 }
 0x18f   :  { %v2046_v17 = vmul.f32 %v6917_v31, %v6937_v32 }
 0x190   :  { %v2067_v53 = vsel %vm2051_vm9, %v2049_v51, 0.0 }
 0x191   :  { %v2062_v62 = vsel %vm2051_vm9, %v2046_v17, 0.0 }
 0x1df   :  { %v6944_v45 = vpop.f32.mrb[0].mxu0 }
 0x1e0   :  { %v2038_v14 = vmul.f32 %v6932_v9, %v6944_v45  ;;  %v6948_v8 = vpop.f32.mrb[1].mxu0 }
 0x1e1   :  { %v2039_v19 = vmul.f32 %v6942_v40, %v6948_v8 }
 0x1e3   :  { %v6954_v24 = vpop.f32.mrb[2].mxu0  ;;  %v2050_v27 = vadd.f32 %v2039_v19, %v2038_v14 }
 0x1e4   :  { %v2041_v38 = vmul.f32 %v6932_v9, %v6954_v24  ;;  %v6958_v41 = vpop.f32.mrb[3].mxu0 }
 0x1e5   :  { %v2042_v57 = vmul.f32 %v6942_v40, %v6958_v41  ;;  %v2053_v48 = vadd.f32 %v2052_v37, %v2050_v27 }
 0x1e7   :  { %2054 = vadd.xlane.f32.xlu0 %v2053_v48  ;;  %v6965_v21 = vpop.f32.mrb[4].mxu0  ;;  %v2056_v28 = vadd.f32 %v2042_v57, %v2041_v38 }
 0x1e8   :  { %v2044_v13 = vmul.f32 %v6932_v9, %v6965_v21  ;;  %v6969_v59 = vpop.f32.mrb[5].mxu0 }
 0x1e9   :  { %v2045_v58 = vmul.f32 %v6942_v40, %v6969_v59  ;;  %v2058_v47 = vadd.f32 %v2057_v35, %v2056_v28 }
 0x1eb   :  { %2059 = vadd.xlane.f32.xlu1 %v2058_v47  ;;  %v6976_v5 = vpop.f32.mrb[6].mxu0  ;;  %v2061_v49 = vadd.f32 %v2045_v58, %v2044_v13 }
 0x1ec   :  { %v2047_v60 = vmul.f32 %v6932_v9, %v6976_v5  ;;  %v6980_v30 = vpop.f32.mrb[7].mxu0 }
 0x1ed   :  { %v2048_v56 = vmul.f32 %v6942_v40, %v6980_v30  ;;  %v2063_v43 = vadd.f32 %v2062_v62, %v2061_v49 }
 0x1ef   :  { %2064 = vadd.xlane.f32.xlu1 %v2063_v43  ;;  %v2066_v4 = vadd.f32 %v2048_v56, %v2047_v60 }
 0x1f1   :  { %v2068_v33 = vadd.f32 %v2067_v53, %v2066_v4 }
 0x1f3   :  { %2069 = vadd.xlane.f32.xlu1 %v2068_v33 }
 0x20f   :  { %v3790_v12 = vpop.f32.mrb[8].mxu1 }
 0x210   :  { %v3792_v20 = vpop.f32.mrb[9].mxu1 }
 0x213   :  { %v3796_v42 = vpop.f32.mrb[10].mxu1 }
 0x214   :  { %v3798_v2 = vpop.f32.mrb[11].mxu1 }
 0x217   :  { %v3802_v10 = vpop.f32.mrb[12].mxu1 }
 0x218   :  { %v3804_v6 = vpop.f32.mrb[13].mxu1 }
 0x21b   :  { %v3808_v3 = vpop.f32.mrb[14].mxu1 }
 0x21c   :  { %v3810_v63 = vpop.f32.mrb[15].mxu1 }
 0x21f   :  { %v6988_v34 = vpop.f32.mrb[4].mxu1  ;;  %v2750_v50 = vpop.f32.mrb[12].mxu0 }
 0x220   :  { %v6990_v54 = vadd.f32 %v3790_v12, %v2750_v50  ;;  %v6992_v22 = vpop.f32.mrb[5].mxu1  ;;  %v2752_v61 = vpop.f32.mrb[13].mxu0  ;;  %v3915_v38 = vmul.f32 %v6988_v34, %v6937_v32 }
 0x221   :  { %v6994_v1 = vadd.f32 %v3792_v20, %v2752_v61  ;;  %v3912_v46 = vmul.f32 %v6992_v22, %v6937_v32 }
 0x222   :  { %v3910_v18 = vmul.f32 %v6990_v54, %v6932_v9  ;;  %v3928_v60 = vsel %vm2051_vm9, %v3915_v38, 0.0 }
 0x223   :  { %v3911_v52 = vmul.f32 %v6994_v1, %v6942_v40  ;;  %v7002_v25 = vpop.f32.mrb[6].mxu1  ;;  %v2756_v23 = vpop.f32.mrb[14].mxu0  ;;  %v3923_v36 = vsel %vm2051_vm9, %v3912_v46, 0.0 }
 0x224   :  { %v7004_v55 = vadd.f32 %v3796_v42, %v2756_v23  ;;  %v7006_v14 = vpop.f32.mrb[7].mxu1  ;;  %v2758_v39 = vpop.f32.mrb[15].mxu0  ;;  %v3921_v12 = vmul.f32 %v7002_v25, %v6937_v32 }
 0x225   :  { %v7008_v19 = vadd.f32 %v3798_v2, %v2758_v39  ;;  %v3922_v27 = vadd.f32 %v3911_v52, %v3910_v18  ;;  %v3918_v47 = vmul.f32 %v7006_v14, %v6937_v32 }
 0x226   :  { %v3913_v37 = vmul.f32 %v7004_v55, %v6932_v9 }
 0x227   :  { %v3914_v57 = vmul.f32 %v7008_v19, %v6942_v40  ;;  %v2762_v48 = vpop.f32.mrb[16].mxu0  ;;  %v3924_v28 = vadd.f32 %v3923_v36, %v3922_v27  ;;  %v3933_v42 = vsel %vm2051_vm9, %v3918_v47, 0.0 }
 0x228   :  { %v7017_v13 = vadd.f32 %v3802_v10, %v2762_v48  ;;  %v2764_v35 = vpop.f32.mrb[17].mxu0 }
 0x229   :  { %v7019_v17 = vadd.f32 %v3804_v6, %v2764_v35  ;;  %3925 = vadd.xlane.f32.xlu0 %v3924_v28  ;;  %v3927_v58 = vadd.f32 %v3914_v57, %v3913_v37 }
 0x22a   :  { %v3916_v49 = vmul.f32 %v7017_v13, %v6932_v9 }
 0x22b   :  { %v3917_v62 = vmul.f32 %v7019_v17, %v6942_v40  ;;  %v2768_v51 = vpop.f32.mrb[18].mxu0  ;;  %v3929_v56 = vadd.f32 %v3928_v60, %v3927_v58 }
 0x22c   :  { %v7028_v43 = vadd.f32 %v3808_v3, %v2768_v51  ;;  %v2770_v4 = vpop.f32.mrb[19].mxu0  ;;  %v3938_v3 = vsel %vm2051_vm9, %v3921_v12, 0.0 }
 0x22d   :  { %v7030_v53 = vadd.f32 %v3810_v63, %v2770_v4  ;;  %3930 = vadd.xlane.f32.xlu0 %v3929_v56  ;;  %v3932_v33 = vadd.f32 %v3917_v62, %v3916_v49 }
 0x22e   :  { %v3919_v20 = vmul.f32 %v7028_v43, %v6932_v9 }
 0x22f   :  { %v3920_v2 = vmul.f32 %v7030_v53, %v6942_v40  ;;  %v3934_v10 = vadd.f32 %v3933_v42, %v3932_v33 }
 0x231   :  { %3935 = vadd.xlane.f32.xlu0 %v3934_v10  ;;  %v3937_v6 = vadd.f32 %v3920_v2, %v3919_v20 }
 0x233   :  { %v3939_v63 = vadd.f32 %v3938_v3, %v3937_v6 }
 0x235   :  { %3940 = vadd.xlane.f32.xlu0 %v3939_v63 }
 0x274   :  { %v7040_v50 = vpop.xlane.xlu0 %2054 }
 0x278   :  { %v7042_v61 = vpop.xlane.xlu1 %2059 }
 0x279   :  { %v4171_v0 = vmul.f32 0.00390625, %v7042_v61 }
 0x27c   :  { %v7058_v37 = vpop.xlane.xlu1 %2064 }
 0x2b6   :  { %v7044_v18 = vpop.xlane.xlu0 %3925 }
 0x2b7   :  { %v3942_v46 = vadd.f32 %v7044_v18, %v7040_v50 }
 0x2b9   :  { %v7048_v52 = vmul.f32 0.001953125, %v3942_v46  ;;  %v7086_v46 = vpop.xlane.xlu1 %2069 }
 0x2ba   :  { %v7050_v23 = vpop.xlane.xlu0 %3930 }
 0x2bb   :  { %v3943_v39 = vadd.f32 %v7050_v23, %v7042_v61  ;;  %v3950_v27 = vsub.f32 %v6944_v45, %v7048_v52  ;;  %v3951_v38 = vsub.f32 %v6948_v8, %v7048_v52  ;;  %v3952_v36 = vsub.f32 %v6913_v11, %v7048_v52 }
 0x2bc   :  { %v3974_v57 = vsub.f32 %v6990_v54, %v7048_v52  ;;  %v3975_v48 = vsub.f32 %v6994_v1, %v7048_v52  ;;  %v3976_v28 = vsub.f32 %v6992_v22, %v7048_v52 }
 0x2bd   :  { %v7068_v35 = vmul.f32 0.001953125, %v3943_v39  ;;  %v3962_v58 = vmul.f32 %v3950_v27, %v6932_v9  ;;  %v3963_v47 = vmul.f32 %v3951_v38, %v6942_v40  ;;  %v3964_v60 = vmul.f32 %v3952_v36, %v6937_v32 }
 0x2be   :  { %v7072_v49 = vpop.xlane.xlu0 %3935  ;;  %v3986_v62 = vmul.f32 %v3974_v57, %v6932_v9  ;;  %v3987_v51 = vmul.f32 %v3975_v48, %v6942_v40  ;;  %v3988_v12 = vmul.f32 %v3976_v28, %v6937_v32 }
 0x2bf   :  { %v3944_v56 = vadd.f32 %v7072_v49, %v7058_v37  ;;  %v3998_v4 = vmul.f32 %v3962_v58, %v3962_v58  ;;  %v3999_v33 = vmul.f32 %v3963_v47, %v3963_v47  ;;  %v4000_v20 = vmul.f32 %v3964_v60, %v3964_v60 }
 0x2c0   :  { %v3953_v42 = vsub.f32 %v6954_v24, %v7068_v35  ;;  %v3954_v2 = vsub.f32 %v6958_v41, %v7068_v35  ;;  %v3955_v10 = vsub.f32 %v6911_v16, %v7068_v35  ;;  %v4030_v3 = vmul.f32 %v3986_v62, %v3986_v62 }
 0x2c1   :  { %v4010_v6 = vadd.f32 %v3999_v33, %v3998_v4  ;;  %v4031_v63 = vmul.f32 %v3987_v51, %v3987_v51  ;;  %v4011_v27 = vsel %vm2051_vm9, %v4000_v20, 0.0  ;;  %v7094_v48 = vmul.f32 0.001953125, %v3944_v56 }
 0x2c2   :  { %v7088_v39 = vpop.xlane.xlu0 %3940  ;;  %v3965_v38 = vmul.f32 %v3953_v42, %v6932_v9  ;;  %v3966_v36 = vmul.f32 %v3954_v2, %v6942_v40  ;;  %v3967_v57 = vmul.f32 %v3955_v10, %v6937_v32  ;;  %v4032_v47 = vmul.f32 %v3988_v12, %v3988_v12 }
 0x2c3   :  { %v3945_v28 = vadd.f32 %v7088_v39, %v7086_v46  ;;  %v4012_v58 = vadd.f32 %v4011_v27, %v4010_v6  ;;  %v4042_v4 = vadd.f32 %v4031_v63, %v4030_v3  ;;  %v3977_v42 = vsub.f32 %v7004_v55, %v7068_v35 }
 0x2c4   :  { %v4001_v60 = vmul.f32 %v3965_v38, %v3965_v38  ;;  %v4002_v62 = vmul.f32 %v3966_v36, %v3966_v36  ;;  %v4003_v51 = vmul.f32 %v3967_v57, %v3967_v57  ;;  %v4043_v20 = vsel %vm2051_vm9, %v4032_v47, 0.0 }
 0x2c5   :  { %v7098_v33 = vmul.f32 0.001953125, %v3945_v28  ;;  %4013 = vadd.xlane.f32.xlu1 %v4012_v58  ;;  %v3978_v56 = vsub.f32 %v7008_v19, %v7068_v35  ;;  %v4044_v6 = vadd.f32 %v4043_v20, %v4042_v4  ;;  %v3979_v12 = vsub.f32 %v6988_v34, %v7068_v35 }
 0x2c6   :  { %v4015_v2 = vadd.f32 %v4002_v62, %v4001_v60  ;;  %v4016_v10 = vsel %vm2051_vm9, %v4003_v51, 0.0  ;;  %v3989_v3 = vmul.f32 %v3977_v42, %v6932_v9  ;;  %v3956_v27 = vsub.f32 %v6965_v21, %v7094_v48 }
 0x2c7   :  { %v3990_v63 = vmul.f32 %v3978_v56, %v6942_v40  ;;  %v3957_v38 = vsub.f32 %v6969_v59, %v7094_v48  ;;  %v3991_v57 = vmul.f32 %v3979_v12, %v6937_v32  ;;  %v3958_v28 = vsub.f32 %v6917_v31, %v7094_v48 }
 0x2c8   :  { %v4017_v36 = vadd.f32 %v4016_v10, %v4015_v2  ;;  %v3980_v58 = vsub.f32 %v7017_v13, %v7094_v48  ;;  %v4033_v47 = vmul.f32 %v3989_v3, %v3989_v3  ;;  %v3968_v62 = vmul.f32 %v3956_v27, %v6932_v9 }
 0x2c9   :  { %4045 = vadd.xlane.f32.xlu1 %v4044_v6  ;;  %v4034_v60 = vmul.f32 %v3990_v63, %v3990_v63  ;;  %v3969_v51 = vmul.f32 %v3957_v38, %v6942_v40  ;;  %v4035_v4 = vmul.f32 %v3991_v57, %v3991_v57  ;;  %v3970_v20 = vmul.f32 %v3958_v28, %v6937_v32 }
 0x2ca   :  { %4018 = vadd.xlane.f32.xlu0 %v4017_v36  ;;  %v3981_v42 = vsub.f32 %v7019_v17, %v7094_v48  ;;  %v3982_v56 = vsub.f32 %v7006_v14, %v7094_v48  ;;  %v4004_v10 = vmul.f32 %v3968_v62, %v3968_v62  ;;  %v3992_v6 = vmul.f32 %v3980_v58, %v6932_v9 }
 0x2cb   :  { %v4047_v2 = vadd.f32 %v4034_v60, %v4033_v47  ;;  %v4005_v12 = vmul.f32 %v3969_v51, %v3969_v51  ;;  %v4048_v3 = vsel %vm2051_vm9, %v4035_v4, 0.0  ;;  %v4006_v63 = vmul.f32 %v3970_v20, %v3970_v20 }
 0x2cc   :  { %v3993_v27 = vmul.f32 %v3981_v42, %v6942_v40  ;;  %v3994_v38 = vmul.f32 %v3982_v56, %v6937_v32  ;;  %v4036_v28 = vmul.f32 %v3992_v6, %v3992_v6  ;;  %v3959_v44 = vsub.f32 %v6976_v5, %v7098_v33 }
 0x2cd   :  { %v4049_v36 = vadd.f32 %v4048_v3, %v4047_v2  ;;  %v4020_v57 = vadd.f32 %v4005_v12, %v4004_v10  ;;  %v4021_v7 = vsel %vm2051_vm9, %v4006_v63, 0.0  ;;  %v3960_v58 = vsub.f32 %v6980_v30, %v7098_v33 }
 0x2ce   :  { %v4037_v47 = vmul.f32 %v3993_v27, %v3993_v27  ;;  %v4038_v60 = vmul.f32 %v3994_v38, %v3994_v38  ;;  %v3961_v51 = vsub.f32 %v6915_v15, %v7098_v33  ;;  %v3971_v4 = vmul.f32 %v3959_v44, %v6932_v9 }
 0x2cf   :  { %4050 = vadd.xlane.f32.xlu0 %v4049_v36  ;;  %v4022_v62 = vadd.f32 %v4021_v7, %v4020_v57  ;;  %v3983_v20 = vsub.f32 %v7028_v43, %v7098_v33  ;;  %v3972_v2 = vmul.f32 %v3960_v58, %v6942_v40  ;;  %v3984_v10 = vsub.f32 %v7030_v53, %v7098_v33 }
 0x2d0   :  { %v4052_v42 = vadd.f32 %v4037_v47, %v4036_v28  ;;  %v4053_v56 = vsel %vm2051_vm9, %v4038_v60, 0.0  ;;  %v3973_v12 = vmul.f32 %v3961_v51, %v6937_v32  ;;  %v4007_v7 = vmul.f32 %v3971_v4, %v3971_v4 }
 0x2d1   :  { %4023 = vadd.xlane.f32.xlu1 %v4022_v62  ;;  %v3985_v6 = vsub.f32 %v7002_v25, %v7098_v33  ;;  %v3995_v44 = vmul.f32 %v3983_v20, %v6932_v9  ;;  %v4008_v63 = vmul.f32 %v3972_v2, %v3972_v2  ;;  %v3996_v27 = vmul.f32 %v3984_v10, %v6942_v40 }
 0x2d2   :  { %v4054_v3 = vadd.f32 %v4053_v56, %v4052_v42  ;;  %v4009_v38 = vmul.f32 %v3973_v12, %v3973_v12  ;;  %v5782_v20 = vmov 0  }
 0x2d3   :  { %v3997_v36 = vmul.f32 %v3985_v6, %v6937_v32  ;;  %v4039_v57 = vmul.f32 %v3995_v44, %v3995_v44  ;;  %v4025_v28 = vadd.f32 %v4008_v63, %v4007_v7  ;;  %v4040_v47 = vmul.f32 %v3996_v27, %v3996_v27  ;;  %5719 = vset.pattern.permute.xlu0 %v5782_v20 }
 0x2d4   :  { %4055 = vadd.xlane.f32.xlu0 %v4054_v3  ;;  %v4026_v60 = vsel %vm2051_vm9, %v4009_v38, 0.0  ;;  %5720 = vset.pattern.permute.xlu1 %v5782_v20 }
 0x2d5   :  { %v4041_v58 = vmul.f32 %v3997_v36, %v3997_v36  ;;  %v4027_v62 = vadd.f32 %v4026_v60, %v4025_v28  ;;  %v4057_v51 = vadd.f32 %v4040_v47, %v4039_v57  ;;  %v7157_v36 = vld [vmem:[%s7564_s2] sm:$0xff] }
 0x2d7   :  { %v4058_v4 = vsel %vm2051_vm9, %v4041_v58, 0.0  ;;  %4028 = vadd.xlane.f32.xlu1 %v4027_v62  ;;  %v4266_v58 = vmul.f32 0.00390625, %v7044_v18 }
 0x2d8   :  { %v4059_v9 = vadd.f32 %v4058_v4, %v4057_v51 }
 0x2da   :  { %4060 = vadd.xlane.f32.xlu0 %v4059_v9 }
 0x352   :  { %v4014_v32 = vpop.xlane.xlu1 %4013 }
 0x356   :  { %v4046_v40 = vpop.xlane.xlu1 %4045 }
 0x357   :  { %v4019_v42 = vpop.xlane.xlu0 %4018  ;;  %v4062_v56 = vadd.f32 %v4046_v40, %v4014_v32  ;;  %v7171_v40 = vld [vmem:[%s7564_s2 + $0x8] sm:$0xff] }
 0x359   :  { %v4066_v2 = vmul.f32 0.001953125, %v4062_v56  ;;  %v4267_v56 = vmul.f32 0.00390625, %v7050_v23 }
 0x35b   :  { %v4070_v10 = vadd.f32 1e-05, %v4066_v2 }
 0x35c   :  { %v4051_v12 = vpop.xlane.xlu0 %4050 }
 0x35d   :  { %5735 = vrsqrt.f32 %v4070_v10  ;;  %v4063_v7 = vadd.f32 %v4051_v12, %v4019_v42 }
 0x35e   :  { %v4024_v3 = vpop.xlane.xlu1 %4023 }
 0x35f   :  { %v4067_v6 = vmul.f32 0.001953125, %v4063_v7 }
 0x361   :  { %v4071_v44 = vadd.f32 1e-05, %v4067_v6  ;;  %v4056_v63 = vpop.xlane.xlu0 %4055  ;;  %v4268_v6 = vmul.f32 0.00390625, %v7072_v49 }
 0x362   :  { %v4064_v27 = vadd.f32 %v4056_v63, %v4024_v3 }
 0x363   :  { %5737 = vrsqrt.f32 %v4071_v44 }
 0x364   :  { %v4068_v38 = vmul.f32 0.001953125, %v4064_v27  ;;  %v4029_v47 = vpop.xlane.xlu1 %4028  ;;  %v5784_v27 = vmov 1  }
 0x366   :  { %v4072_v57 = vadd.f32 1e-05, %v4068_v38 }
 0x367   :  { %v5736_v28 = vpop.eup %5735  ;;  %v4061_v60 = vpop.xlane.xlu0 %4060 }
 0x368   :  { %5739 = vrsqrt.f32 %v4072_v57  ;;  %v4065_v62 = vadd.f32 %v4061_v60, %v4029_v47  ;;  %v7161_v51 = vmul.f32 %v5736_v28, %v7157_v36 }
 0x36a   :  { %v4069_v4 = vmul.f32 0.001953125, %v4065_v62  ;;  %v4082_v9 = vmul.f32 %v7161_v51, %v7048_v52  ;;  %v7166_v32 = vmul.f32 %v4266_v58, %v7161_v51  ;;  %v7179_v52 = vld [vmem:[%s7564_s2 + $0x10] sm:$0xff] }
 0x36c   :  { %v4073_v42 = vadd.f32 1e-05, %v4069_v4  ;;  %4090 = vrot.lane.b32.xlu1 %v4082_v9, %s5783_s0  ;;  %v5785_v4 = vmov 3   ;;  %v4194_v9 = vsel %vm18_vm10, 1, %v5782_v20 }
 0x36d   :  { %v5738_v18 = vpop.eup %5737 }
 0x36e   :  { %5741 = vrsqrt.f32 %v4073_v42  ;;  %v4079_v2 = vmul.f32 %v5738_v18, %v7171_v40  ;;  %v7218_v18 = vrot.slane %v4194_v9, %v2025_v26 }
 0x370   :  { %v4083_v10 = vmul.f32 %v4079_v2, %v7068_v35  ;;  %v7181_v12 = vmul.f32 %v4267_v56, %v4079_v2  ;;  %v7196_v35 = vld [vmem:[%s7564_s2 + $0x18] sm:$0xff]  ;;  %v7674_v56 = vsub.s32 1, %v6919_v29  ;;  %vm4207_vm11 = vcmp.eq.s32.totalorder %v7218_v18, 1  ;;  %s5786_s2 = smov 2  }
 0x372   :  { %v5740_v7 = vpop.eup %5739  ;;  %4092 = vrot.lane.b32.xlu0 %v4083_v10, %s5783_s0  ;;  %v7222_v10 = vrot.slane %v4194_v9, %v7674_v56 }
 0x373   :  { %v7185_v44 = vmul.f32 %v5740_v7, %v7179_v52  ;;  %v7675_v7 = vsub.s32 2, %v6919_v29 }
 0x374   :  { %vm4208_vm12 = vcmp.eq.s32.totalorder %v7222_v10, 1 }
 0x375   :  { %v4084_v23 = vmul.f32 %v7185_v44, %v7094_v48  ;;  %v7190_v3 = vmul.f32 %v4268_v6, %v7185_v44  ;;  %v7226_v6 = vrot.slane %v4194_v9, %v7675_v7 }
 0x376   :  { %4108 = vperm.xlu0 %5719, %v7161_v51  }
 0x377   :  { %4094 = vrot.lane.b32.xlu1 %v4084_v23, %s5783_s0  ;;  %v4170_v23 = vmul.f32 0.00390625, %v7040_v50  ;;  %vm4209_vm13 = vcmp.eq.s32.totalorder %v7226_v6, 1  ;;  %v4175_v50 = vmul.f32 %v4171_v0, %v4079_v2 }
 0x378   :  { %v5742_v63 = vpop.eup %5741 }
 0x379   :  { %v7199_v49 = vmul.f32 %v5742_v63, %v7196_v35  ;;  %v7234_v26 = vmul.f32 %v4170_v23, %v7161_v51 }
 0x37a   :  { %5721 = vset.pattern.permute.xlu0 %v5784_v27 }
 0x37b   :  { %v4085_v48 = vmul.f32 %v7199_v49, %v7098_v33 }
 0x37d   :  { %4096 = vrot.lane.b32.xlu1 %v4085_v48, %s5783_s0 }
 0x381   :  { %4113 = vperm.xlu1 %5720, %v4079_v2  }
 0x385   :  { %4118 = vperm.xlu1 %5720, %v7185_v44  }
 0x389   :  { %4123 = vperm.xlu1 %5720, %v7199_v49  }
 0x38d   :  { %5722 = vset.pattern.permute.xlu1 %v5784_v27 }
 0x3de   :  { %v4091_v38 = vpop.permute.xlu1 %4090 }
 0x3df   :  { %v4102_v57 = vsub.f32 %v7157_v36, %v4091_v38 }
 0x3e1   :  { %4140 = vperm.xlu0 %5721, %v4102_v57  }
 0x3e4   :  { %v4093_v28 = vpop.permute.xlu0 %4092 }
 0x3e5   :  { %v4103_v47 = vsub.f32 %v7171_v40, %v4093_v28 }
 0x3e7   :  { %4145 = vperm.xlu1 %5722, %v4103_v47  }
 0x3e9   :  { %v4095_v60 = vpop.permute.xlu1 %4094 }
 0x3ea   :  { %v4104_v58 = vsub.f32 %v7179_v52, %v4095_v60 }
 0x3eb   :  { %4180 = vrot.lane.b32.xlu1 %v4103_v47, %s5773_s27 }
 0x3ec   :  { %4150 = vperm.xlu0 %5721, %v4104_v58  }
 0x3ef   :  { %v4097_v33 = vpop.permute.xlu1 %4096 }
 0x3f0   :  { %v4105_v62 = vsub.f32 %v7196_v35, %v4097_v33  ;;  %4178 = vrot.lane.b32.xlu0 %v4102_v57, %s5773_s27 }
 0x3f1   :  { %5724 = vset.pattern.permute.xlu0 %v5785_v4 }
 0x3f2   :  { %4155 = vperm.xlu1 %5722, %v4105_v62  }
 0x3f4   :  { %4182 = vrot.lane.b32.xlu0 %v4104_v58, %s5773_s27 }
 0x3f5   :  { %v4109_v63 = vpop.permute.xlu0 %4108 }
 0x3f6   :  { %5723 = vset.pattern.permute.xlu1 %v5785_v4  ;;  %v4126_v48 = vmul.f32 %v4109_v63, %v6944_v45  ;;  %v4127_v29 = vmul.f32 %v4109_v63, %v6948_v8  ;;  %v4128_v38 = vmul.f32 %v6913_v11, %v4109_v63  ;;  %v4242_v57 = vmul.f32 %v6990_v54, %v4109_v63 }
 0x3f7   :  { %4366 = vperm.xlu1 %5723, %v7157_v36   ;;  %v4243_v61 = vmul.f32 %v6994_v1, %v4109_v63  ;;  %v4244_v28 = vmul.f32 %v4109_v63, %v6992_v22 }
 0x3fb   :  { %4184 = vrot.lane.b32.xlu1 %v4105_v62, %s5773_s27 }
 0x400   :  { %v4114_v42 = vpop.permute.xlu1 %4113 }
 0x401   :  { %v4129_v47 = vmul.f32 %v4114_v42, %v6954_v24  ;;  %v4130_v58 = vmul.f32 %v4114_v42, %v6958_v41  ;;  %v4131_v51 = vmul.f32 %v6911_v16, %v4114_v42  ;;  %v4245_v45 = vmul.f32 %v7004_v55, %v4114_v42 }
 0x402   :  { %v4246_v8 = vmul.f32 %v7008_v19, %v4114_v42  ;;  %v4247_v41 = vmul.f32 %v6988_v34, %v4114_v42 }
 0x404   :  { %v4119_v27 = vpop.permute.xlu1 %4118 }
 0x405   :  { %v4132_v16 = vmul.f32 %v4119_v27, %v6965_v21  ;;  %v4133_v7 = vmul.f32 %v4119_v27, %v6969_v59  ;;  %v4134_v23 = vmul.f32 %v6917_v31, %v4119_v27  ;;  %v4248_v63 = vmul.f32 %v7017_v13, %v4119_v27 }
 0x408   :  { %v7255_v22 = vpop.permute.xlu1 %4123 }
 0x409   :  { %v4135_v59 = vmul.f32 %v7255_v22, %v6976_v5 }
 0x460   :  { %v4141_v60 = vpop.permute.xlu0 %4140 }
 0x461   :  { %v7247_v33 = vadd.f32 %v4141_v60, %v4126_v48  ;;  %v7249_v11 = vadd.f32 %v4141_v60, %v4127_v29  ;;  %v7251_v54 = vadd.f32 %v4141_v60, %v4128_v38  ;;  %v7253_v1 = vadd.f32 %v4242_v57, %v4141_v60 }
 0x462   :  { %v7257_v24 = vadd.f32 %v4243_v61, %v4141_v60  ;;  %v7259_v2 = vadd.f32 %v4244_v28, %v4141_v60  ;;  %v4249_v38 = vmul.f32 %v7019_v17, %v4119_v27  ;;  %v4250_v57 = vmul.f32 %v4119_v27, %v7006_v14 }
 0x463   :  { %v4210_v55 = vsel %vm4207_vm11, %v7247_v33, -inf  ;;  %v4211_v19 = vsel %vm4208_vm12, %v7249_v11, -inf  ;;  %v4212_v62 = vsel %vm4209_vm13, %v7251_v54, -inf  ;;  %v4278_v4 = vsel %vm4207_vm11, %v7253_v1, -inf }
 0x464   :  { %v4222_v9 = vmax.f32 %v4210_v55, %v4211_v19  ;;  %v4223_v21 = vsel %vm2051_vm9, %v4212_v62, -inf  ;;  %v4279_v34 = vsel %vm4208_vm12, %v7257_v24, -inf  ;;  %v4280_v42 = vsel %vm4209_vm13, %v7259_v2, -inf }
 0x465   :  { %v4290_v56 = vmax.f32 %v4278_v4, %v4279_v34  ;;  %v4291_v29 = vsel %vm2051_vm9, %v4280_v42, -inf  ;;  %v4136_v17 = vmul.f32 %v7255_v22, %v6980_v30 }
 0x466   :  { %v4146_v0 = vpop.permute.xlu1 %4145  ;;  %v4224_v48 = vmax.f32 %v4222_v9, %v4223_v21  ;;  %v4137_v9 = vmul.f32 %v6915_v15, %v7255_v22 }
 0x467   :  { %v7288_v61 = vadd.f32 %v4146_v0, %v4129_v47  ;;  %v7290_v28 = vadd.f32 %v4146_v0, %v4130_v58  ;;  %v7292_v60 = vadd.f32 %v4146_v0, %v4131_v51  ;;  %v7296_v31 = vadd.f32 %v4245_v45, %v4146_v0 }
 0x468   :  { %4225 = vmax.xlane.f32.xlu0 %v4224_v48  ;;  %v7298_v13 = vadd.f32 %v4246_v8, %v4146_v0  ;;  %v7300_v55 = vadd.f32 %v4247_v41, %v4146_v0  ;;  %v4292_v14 = vmax.f32 %v4290_v56, %v4291_v29 }
 0x469   :  { %v4213_v27 = vsel %vm4207_vm11, %v7288_v61, -inf  ;;  %v4214_v47 = vsel %vm4208_vm12, %v7290_v28, -inf  ;;  %v4215_v5 = vsel %vm4209_vm13, %v7292_v60, -inf  ;;  %v4281_v30 = vsel %vm4207_vm11, %v7296_v31, -inf }
 0x46a   :  { %v7313_v58 = vpop.permute.xlu1 %4180  ;;  %v4227_v51 = vmax.f32 %v4213_v27, %v4214_v47  ;;  %v4228_v45 = vsel %vm2051_vm9, %v4215_v5, -inf  ;;  %v4282_v8 = vsel %vm4208_vm12, %v7298_v13, -inf  ;;  %v4283_v62 = vsel %vm4209_vm13, %v7300_v55, -inf }
 0x46b   :  { %v4151_v41 = vpop.permute.xlu0 %4150  ;;  %v7323_v19 = vadd.f32 %v7313_v58, %v4175_v50  ;;  %v4295_v4 = vmax.f32 %v4281_v30, %v4282_v8  ;;  %v4296_v0 = vsel %vm2051_vm9, %v4283_v62, -inf  ;;  %v4253_v62 = vmul.f32 %v7002_v25, %v7255_v22 }
 0x46c   :  { %4293 = vmax.xlane.f32.xlu0 %v4292_v14  ;;  %v4229_v21 = vmax.f32 %v4227_v51, %v4228_v45  ;;  %v7330_v34 = vadd.f32 %v4151_v41, %v4132_v16  ;;  %v7332_v42 = vadd.f32 %v4151_v41, %v4133_v7  ;;  %v7334_v56 = vadd.f32 %v4151_v41, %v4134_v23 }
 0x46d   :  { %v7337_v50 = vadd.f32 %v4248_v63, %v4151_v41  ;;  %v7339_v48 = vadd.f32 %v4249_v38, %v4151_v41  ;;  %v7341_v29 = vadd.f32 %v4250_v57, %v4151_v41  ;;  %v4251_v23 = vmul.f32 %v7028_v43, %v7255_v22 }
 0x46e   :  { %4230 = vmax.xlane.f32.xlu1 %v4229_v21  ;;  %v4216_v15 = vsel %vm4207_vm11, %v7330_v34, -inf  ;;  %v4217_v16 = vsel %vm4208_vm12, %v7332_v42, -inf  ;;  %v4218_v7 = vsel %vm4209_vm13, %v7334_v56, -inf  ;;  %v4297_v5 = vmax.f32 %v4295_v4, %v4296_v0 }
 0x46f   :  { %v4179_v63 = vpop.permute.xlu0 %4178  ;;  %v4232_v38 = vmax.f32 %v4216_v15, %v4217_v16  ;;  %v4233_v57 = vsel %vm2051_vm9, %v4218_v7, -inf  ;;  %v4284_v14 = vsel %vm4207_vm11, %v7337_v50, -inf  ;;  %v4285_v27 = vsel %vm4208_vm12, %v7339_v48, -inf }
 0x470   :  { %v7362_v47 = vadd.f32 %v4179_v63, %v7234_v26  ;;  %v4286_v43 = vsel %vm4209_vm13, %v7341_v29, -inf  ;;  %v4300_v51 = vmax.f32 %v4284_v14, %v4285_v27  ;;  %v4252_v41 = vmul.f32 %v7030_v53, %v7255_v22 }
 0x471   :  { %v4156_v45 = vpop.permute.xlu1 %4155  ;;  %v4234_v30 = vmax.f32 %v4232_v38, %v4233_v57  ;;  %v4301_v8 = vsel %vm2051_vm9, %v4286_v43, -inf  ;;  %v4274_v18 = vadd.f32 %v7166_v32, %v4179_v63  ;;  %v5787_v43 = vmov 2  }
 0x472   :  { %4298 = vmax.xlane.f32.xlu1 %v4297_v5  ;;  %v7372_v21 = vadd.f32 %v4156_v45, %v4135_v59  ;;  %v7374_v26 = vadd.f32 %v4156_v45, %v4136_v17  ;;  %v7376_v4 = vadd.f32 %v4156_v45, %v4137_v9  ;;  %v7378_v0 = vadd.f32 %v4251_v23, %v4156_v45 }
 0x473   :  { %4235 = vmax.xlane.f32.xlu0 %v4234_v30  ;;  %v7380_v15 = vadd.f32 %v4252_v41, %v4156_v45  ;;  %v7382_v16 = vadd.f32 %v4253_v62, %v4156_v45  ;;  %v4302_v7 = vmax.f32 %v4300_v51, %v4301_v8  ;;  %v4275_v6 = vadd.f32 %v7181_v12, %v7313_v58  ;;  %v4183_v51 = vpop.permute.xlu0 %4182 }
 0x474   :  { %v4219_v53 = vsel %vm4207_vm11, %v7372_v21, -inf  ;;  %v4220_v25 = vsel %vm4208_vm12, %v7374_v26, -inf  ;;  %v4221_v22 = vsel %vm4209_vm13, %v7376_v4, -inf  ;;  %v4287_v17 = vsel %vm4207_vm11, %v7378_v0, -inf }
 0x475   :  { %v4237_v59 = vmax.f32 %v4219_v53, %v4220_v25  ;;  %v4288_v9 = vsel %vm4208_vm12, %v7380_v15, -inf  ;;  %v4238_v23 = vsel %vm2051_vm9, %v4221_v22, -inf  ;;  %v4289_v38 = vsel %vm4209_vm13, %v7382_v16, -inf }
 0x476   :  { %4303 = vmax.xlane.f32.xlu1 %v4302_v7  ;;  %v4305_v14 = vmax.f32 %v4287_v17, %v4288_v9  ;;  %v4306_v27 = vsel %vm2051_vm9, %v4289_v38, -inf  ;;  %v4367_v10 = vpop.permute.xlu1 %4366  ;;  %v4269_v45 = vmul.f32 0.00390625, %v7088_v39  ;;  %v4276_v30 = vadd.f32 %v7190_v3, %v4183_v51 }
 0x477   :  { %v4239_v57 = vmax.f32 %v4237_v59, %v4238_v23  ;;  %v5788_v41 = vmov 5   ;;  %v4172_v38 = vmul.f32 0.00390625, %v7058_v37 }
 0x478   :  { %v4307_v5 = vmax.f32 %v4305_v14, %v4306_v27  ;;  %v4273_v32 = vmul.f32 %v4269_v45, %v7199_v49 }
 0x479   :  { %4240 = vmax.xlane.f32.xlu0 %v4239_v57  ;;  %v4176_v27 = vmul.f32 %v4172_v38, %v7185_v44 }
 0x47a   :  { %v4185_v8 = vpop.permute.xlu1 %4184 }
 0x47b   :  { %v4277_v63 = vadd.f32 %v4273_v32, %v4185_v8 }
 0x47d   :  { %4308 = vmax.xlane.f32.xlu0 %v4307_v5 }
 0x487   :  { %4374 = vperm.xlu1 %5723, %v7179_v52  }
 0x48b   :  { %4378 = vperm.xlu1 %5723, %v7196_v35  }
 0x48f   :  { %4314 = vrot.lane.b32.xlu1 %v4274_v18, %s5786_s2 }
 0x490   :  { %5725 = vset.pattern.permute.xlu1 %v5787_v43 }
 0x493   :  { %4316 = vrot.lane.b32.xlu1 %v4275_v6, %s5786_s2  ;;  %4370 = vperm.xlu0 %5724, %v7171_v40  }
 0x497   :  { %4318 = vrot.lane.b32.xlu1 %v4276_v30, %s5786_s2  ;;  %5726 = vset.pattern.permute.xlu0 %v5787_v43  ;;  %v4192_v30 = vadd.f32 %v4183_v51, %v4176_v27 }
 0x498   :  { %4353 = vperm.xlu0 %5726, %v7179_v52  }
 0x49b   :  { %4320 = vrot.lane.b32.xlu1 %v4277_v63, %s5786_s2 }
 0x49c   :  { %5728 = vset.pattern.permute.xlu0 %v5788_v41 }
 0x49f   :  { %4343 = vperm.xlu1 %5725, %v7157_v36  }
 0x4a3   :  { %4348 = vperm.xlu1 %5725, %v7171_v40  }
 0x4a7   :  { %4358 = vperm.xlu1 %5725, %v7196_v35  }
 0x4ab   :  { %5727 = vset.pattern.permute.xlu1 %v5788_v41 }
 0x4f5   :  { %v4226_v39 = vpop.xlane.xlu0 %4225 }
 0x4f6   :  { %v4327_v59 = vsel %vm4326_vm14, %v7362_v47, %v4226_v39  ;;  %v4173_v47 = vmul.f32 0.00390625, %v7086_v46 }
 0x4f8   :  { %v4177_v63 = vmul.f32 %v4173_v47, %v7199_v49  ;;  %v5790_v49 = vmov 4  }
 0x4f9   :  { %v4294_v3 = vpop.xlane.xlu0 %4293 }
 0x4fb   :  { %v4231_v12 = vpop.xlane.xlu1 %4230 }
 0x4fc   :  { %v4328_v5 = vsel %vm4326_vm14, %v7323_v19, %v4231_v12  ;;  %v4193_v19 = vadd.f32 %v4185_v8, %v4177_v63 }
 0x4ff   :  { %v4299_v58 = vpop.xlane.xlu1 %4298 }
 0x500   :  { %v4236_v62 = vpop.xlane.xlu0 %4235 }
 0x503   :  { %v4304_v7 = vpop.xlane.xlu1 %4303 }
 0x506   :  { %v4241_v25 = vpop.xlane.xlu0 %4240 }
 0x507   :  { %v4375_v53 = vpop.permute.xlu1 %4374 }
 0x50a   :  { %v4309_v17 = vpop.xlane.xlu0 %4308 }
 0x50b   :  { %v4379_v22 = vpop.permute.xlu1 %4378 }
 0x50f   :  { %v4315_v9 = vpop.permute.xlu1 %4314 }
 0x510   :  { %v4332_v23 = vsel %vm4331_vm15, %v4327_v59, %v4315_v9 }
 0x511   :  { %v4337_v57 = vsel %vm4336_vm0, %v4332_v23, %v4294_v3  ;;  %v4330_v3 = vsel %vm4326_vm14, %v4193_v19, %v4241_v25 }
 0x512   :  { %v4381_v14 = vmul.f32 %v4367_v10, %v4337_v57  ;;  %v4371_v6 = vpop.permute.xlu0 %4370  ;;  %v4329_v10 = vsel %vm4326_vm14, %v4192_v30, %v4236_v62 }
 0x513   :  { %v4317_v18 = vpop.permute.xlu1 %4316 }
 0x514   :  { %v4333_v45 = vsel %vm4331_vm15, %v4328_v5, %v4317_v18  ;;  %4389 = vrot.lane.b32.xlu1 %v4381_v14, %s5789_s29 }
 0x515   :  { %v4338_v32 = vsel %vm4336_vm0, %v4333_v45, %v4299_v58 }
 0x516   :  { %v4382_v37 = vmul.f32 %v4371_v6, %v4338_v32 }
 0x517   :  { %v4319_v44 = vpop.permute.xlu1 %4318 }
 0x518   :  { %v4334_v41 = vsel %vm4331_vm15, %v4329_v10, %v4319_v44  ;;  %4391 = vrot.lane.b32.xlu0 %v4382_v37, %s5789_s29 }
 0x519   :  { %v4339_v39 = vsel %vm4336_vm0, %v4334_v41, %v4304_v7 }
 0x51a   :  { %v4383_v12 = vmul.f32 %v4375_v53, %v4339_v39  ;;  %v4354_v53 = vpop.permute.xlu0 %4353 }
 0x51b   :  { %v4321_v59 = vpop.permute.xlu1 %4320  ;;  %v4363_v23 = vmul.f32 %v4354_v53, %v4339_v39 }
 0x51c   :  { %v4335_v46 = vsel %vm4331_vm15, %v4330_v3, %v4321_v59  ;;  %4393 = vrot.lane.b32.xlu1 %v4383_v12, %s5789_s29 }
 0x51d   :  { %v4340_v51 = vsel %vm4336_vm0, %v4335_v46, %v4309_v17 }
 0x51e   :  { %v4384_v58 = vmul.f32 %v4379_v22, %v4340_v51 }
 0x51f   :  { %v4344_v8 = vpop.permute.xlu1 %4343 }
 0x520   :  { %4442 = vperm.xlu1 %5727, %v7157_v36   ;;  %4395 = vrot.lane.b32.xlu0 %v4384_v58, %s5789_s29  ;;  %v4361_v22 = vmul.f32 %v4344_v8, %v4337_v57 }
 0x523   :  { %v4349_v62 = vpop.permute.xlu1 %4348 }
 0x524   :  { %4450 = vperm.xlu1 %5727, %v7179_v52   ;;  %4446 = vperm.xlu0 %5728, %v7171_v40   ;;  %v4362_v17 = vmul.f32 %v4349_v62, %v4338_v32 }
 0x527   :  { %v4359_v7 = vpop.permute.xlu1 %4358 }
 0x528   :  { %4454 = vperm.xlu1 %5727, %v7196_v35   ;;  %5729 = vset.pattern.permute.xlu0 %v5790_v49  ;;  %v4364_v5 = vmul.f32 %v4359_v7, %v4340_v51 }
 0x529   :  { %4422 = vperm.xlu0 %5729, %v7157_v36  }
 0x52c   :  { %5730 = vset.pattern.permute.xlu1 %v5790_v49 }
 0x52d   :  { %4426 = vperm.xlu1 %5730, %v7171_v40   ;;  %4434 = vperm.xlu0 %5729, %v7196_v35  }
 0x531   :  { %4430 = vperm.xlu1 %5730, %v7179_v52   ;;  %5732 = vset.pattern.permute.xlu0 %v5782_v20 }
 0x535   :  { %5731 = vset.pattern.permute.xlu1 %v5782_v20 }
 0x586   :  { %v4390_v25 = vpop.permute.xlu1 %4389 }
 0x587   :  { %v4402_v36 = vsel %vm4401_vm1, %v4361_v22, %v4390_v25 }
 0x588   :  { %v4407_v9 = vsel %vm4406_vm2, %v4402_v36, 0.0 }
 0x58a   :  { %v4392_v40 = vpop.permute.xlu0 %4391 }
 0x58b   :  { %v4403_v35 = vsel %vm4401_vm1, %v4362_v17, %v4392_v40 }
 0x58c   :  { %v4408_v52 = vsel %vm4406_vm2, %v4403_v35, 0.0 }
 0x58d   :  { %v4409_v38 = vadd.f32 %v4408_v52, %v4407_v9 }
 0x58e   :  { %v4394_v14 = vpop.permute.xlu1 %4393 }
 0x58f   :  { %v4404_v20 = vsel %vm4401_vm1, %v4363_v23, %v4394_v14 }
 0x590   :  { %v4410_v27 = vsel %vm4406_vm2, %v4404_v20, 0.0 }
 0x591   :  { %v4411_v18 = vadd.f32 %v4410_v27, %v4409_v38 }
 0x592   :  { %v4396_v6 = vpop.permute.xlu0 %4395 }
 0x593   :  { %v4405_v57 = vsel %vm4401_vm1, %v4364_v5, %v4396_v6 }
 0x594   :  { %v4412_v45 = vsel %vm4406_vm2, %v4405_v57, 0.0 }
 0x595   :  { %v4413_v47 = vadd.f32 %v4412_v45, %v4411_v18 }
 0x597   :  { %v4414_v30 = vrot.slane %v4413_v47, 4 }
 0x599   :  { %v4415_v32 = vadd.f32 %v4414_v30, %v4413_v47 }
 0x59b   :  { %v4416_v37 = vrot.slane %v4415_v32, 2 }
 0x59d   :  { %v4417_v63 = vadd.f32 %v4416_v37, %v4415_v32 }
 0x59f   :  { %v4418_v10 = vrot.slane %v4417_v63, 1  ;;  %v4443_v44 = vpop.permute.xlu1 %4442 }
 0x5a1   :  { %v4419_v41 = vadd.f32 %v4418_v10, %v4417_v63 }
 0x5a3   :  { %v4420_v19 = vmax.f32 %v4419_v41, 0.0  ;;  %v4451_v39 = vpop.permute.xlu1 %4450  ;;  %v4447_v12 = vpop.permute.xlu0 %4446 }
 0x5a5   :  { %v4457_v3 = vmul.f32 %v4443_v44, %v4420_v19  ;;  %v4458_v59 = vmul.f32 %v4447_v12, %v4420_v19  ;;  %v4459_v58 = vmul.f32 %v4451_v39, %v4420_v19 }
 0x5a7   :  { %4467 = vrot.lane.b32.xlu0 %v4458_v59, %s5791_s8  ;;  %4465 = vrot.lane.b32.xlu1 %v4457_v3, %s5791_s8  ;;  %v4455_v46 = vpop.permute.xlu1 %4454 }
 0x5a8   :  { %v4460_v51 = vmul.f32 %v4455_v46, %v4420_v19  ;;  %v4423_v49 = vpop.permute.xlu0 %4422 }
 0x5a9   :  { %v4437_v53 = vmul.f32 %v4423_v49, %v4420_v19 }
 0x5ab   :  { %4469 = vrot.lane.b32.xlu1 %v4459_v58, %s5791_s8  ;;  %4471 = vrot.lane.b32.xlu0 %v4460_v51, %s5791_s8 }
 0x5ac   :  { %v4427_v8 = vpop.permute.xlu1 %4426  ;;  %v4435_v62 = vpop.permute.xlu0 %4434 }
 0x5ad   :  { %v4438_v25 = vmul.f32 %v4427_v8, %v4420_v19  ;;  %v4440_v35 = vmul.f32 %v4435_v62, %v4420_v19 }
 0x5b0   :  { %v4431_v7 = vpop.permute.xlu1 %4430 }
 0x5b1   :  { %v4439_v9 = vmul.f32 %v4431_v7, %v4420_v19 }
 0x619   :  { %v4468_v22 = vpop.permute.xlu0 %4467  ;;  %v4466_v17 = vpop.permute.xlu1 %4465 }
 0x61a   :  { %v4478_v36 = vadd.f32 %v4468_v22, %v4438_v25  ;;  %v4477_v40 = vadd.f32 %v4466_v17, %v4437_v53 }
 0x61c   :  { %4487 = vrot.lane.b32.xlu0 %v4478_v36, %s5773_s27  ;;  %4485 = vrot.lane.b32.xlu1 %v4477_v40, %s5773_s27 }
 0x61d   :  { %v4472_v52 = vpop.permute.xlu0 %4471  ;;  %v4470_v23 = vpop.permute.xlu1 %4469 }
 0x61e   :  { %v4480_v38 = vadd.f32 %v4472_v52, %v4440_v35  ;;  %v4479_v14 = vadd.f32 %v4470_v23, %v4439_v9 }
 0x620   :  { %4491 = vrot.lane.b32.xlu0 %v4480_v38, %s5773_s27  ;;  %4489 = vrot.lane.b32.xlu1 %v4479_v14, %s5773_s27 }
 0x68e   :  { %v4488_v20 = vpop.permute.xlu0 %4487  ;;  %v4486_v27 = vpop.permute.xlu1 %4485 }
 0x68f   :  { %v4498_v5 = vadd.f32 %v4488_v20, %v4478_v36  ;;  %v4497_v18 = vadd.f32 %v4486_v27, %v4477_v40 }
 0x691   :  { %v4821_v6 = vmul.f32 -1.442695, %v4498_v5  ;;  %v4820_v57 = vmul.f32 -1.442695, %v4497_v18 }
 0x692   :  { %v4492_v45 = vpop.permute.xlu0 %4491  ;;  %v4490_v47 = vpop.permute.xlu1 %4489 }
 0x693   :  { %5743 = vpow2.f32 %v4821_v6  ;;  %v4500_v30 = vadd.f32 %v4492_v45, %v4480_v38  ;;  %v4499_v32 = vadd.f32 %v4490_v47, %v4479_v14 }
 0x694   :  { %5745 = vpow2.f32 %v4820_v57 }
 0x695   :  { %v4823_v37 = vmul.f32 -1.442695, %v4500_v30  ;;  %v4822_v63 = vmul.f32 -1.442695, %v4499_v32 }
 0x697   :  { %5747 = vpow2.f32 %v4823_v37 }
 0x698   :  { %5749 = vpow2.f32 %v4822_v63 }
 0x69d   :  { %v5744_v10 = vpop.eup %5743 }
 0x69e   :  { %v5746_v44 = vpop.eup %5745  ;;  %v4514_v41 = vadd.f32 1.0, %v5744_v10 }
 0x69f   :  { %v4513_v19 = vadd.f32 1.0, %v5746_v44 }
 0x6a0   :  { %5751 = vrcp.f32 %v4514_v41 }
 0x6a1   :  { %v5748_v39 = vpop.eup %5747  ;;  %5753 = vrcp.f32 %v4513_v19 }
 0x6a2   :  { %v5750_v12 = vpop.eup %5749  ;;  %v4516_v59 = vadd.f32 1.0, %v5748_v39 }
 0x6a3   :  { %v4515_v3 = vadd.f32 1.0, %v5750_v12 }
 0x6a5   :  { %5755 = vrcp.f32 %v4515_v3 }
 0x6a6   :  { %5757 = vrcp.f32 %v4516_v59 }
 0x6aa   :  { %v5752_v46 = vpop.eup %5751 }
 0x6ab   :  { %v5754_v51 = vpop.eup %5753  ;;  %4532 = vperm.xlu0 %5732, %v5752_v46  }
 0x6ac   :  { %4527 = vperm.xlu1 %5731, %v5754_v51  }
 0x6af   :  { %v5756_v58 = vpop.eup %5755  ;;  %5733 = vset.pattern.permute.xlu0 %v5787_v43 }
 0x6b0   :  { %4537 = vperm.xlu1 %5731, %v5756_v58   ;;  %4582 = vperm.xlu0 %5733, %v5754_v51   ;;  %v5758_v49 = vpop.eup %5757 }
 0x6b4   :  { %4542 = vperm.xlu1 %5731, %v5758_v49   ;;  %4594 = vperm.xlu0 %5733, %v5758_v49  }
 0x6b8   :  { %5734 = vset.pattern.permute.xlu1 %v5787_v43 }
 0x6b9   :  { %4586 = vperm.xlu1 %5734, %v5752_v46  }
 0x6bd   :  { %4590 = vperm.xlu1 %5734, %v5756_v58  }
 0x72a   :  { %v4533_v8 = vpop.permute.xlu0 %4532 }
 0x72b   :  { %v4548_v62 = vmul.f32 %v4533_v8, %v7288_v61  ;;  %v4549_v7 = vmul.f32 %v4533_v8, %v7290_v28  ;;  %v4550_v53 = vmul.f32 %v4533_v8, %v7292_v60  ;;  %v4528_v25 = vpop.permute.xlu1 %4527 }
 0x72c   :  { %v4545_v22 = vmul.f32 %v4528_v25, %v7247_v33  ;;  %v4546_v17 = vmul.f32 %v4528_v25, %v7249_v11  ;;  %v4547_v36 = vmul.f32 %v4528_v25, %v7251_v54 }
 0x72d   :  { %v4560_v40 = vmax.f32 %v4548_v62, 0.0  ;;  %v4561_v35 = vmax.f32 %v4549_v7, 0.0  ;;  %v4562_v9 = vmax.f32 %v4550_v53, 0.0 }
 0x72e   :  { %v4557_v43 = vmax.f32 %v4545_v22, 0.0  ;;  %v4558_v52 = vmax.f32 %v4546_v17, 0.0  ;;  %v4559_v23 = vmax.f32 %v4547_v36, 0.0 }
 0x72f   :  { %4572 = vst [vmem:[%s7565_s4 + $0x18] sm:$0xff] %v4560_v40  ;;  %4573 = vst [vmem:[%s7565_s4 + $0x20] sm:$0xff] %v4561_v35  ;;  %v4538_v33 = vpop.permute.xlu1 %4537  ;;  %v4583_v11 = vpop.permute.xlu0 %4582 }
 0x730   :  { %4574 = vst.msk [vmem:[%s7565_s4 + $0x28] sm:$0xff] %vm2051_vm9, %v4562_v9  ;;  %4569 = vst [vmem:[%s7565_s4] sm:$0xff] %v4557_v43  ;;  %v4551_v54 = vmul.f32 %v4538_v33, %v7330_v34  ;;  %v4552_v61 = vmul.f32 %v4538_v33, %v7332_v42  ;;  %v4553_v28 = vmul.f32 %v4538_v33, %v7334_v56 }
 0x731   :  { %4570 = vst [vmem:[%s7565_s4 + $0x8] sm:$0xff] %v4558_v52  ;;  %4571 = vst.msk [vmem:[%s7565_s4 + $0x10] sm:$0xff] %vm2051_vm9, %v4559_v23  ;;  %v4597_v60 = vmul.f32 %v4583_v11, %v7253_v1  ;;  %v4598_v38 = vmul.f32 %v4583_v11, %v7257_v24  ;;  %v4599_v14 = vmul.f32 %v4583_v11, %v7259_v2 }
 0x732   :  { %v4563_v20 = vmax.f32 %v4551_v54, 0.0  ;;  %v4564_v27 = vmax.f32 %v4552_v61, 0.0  ;;  %v4565_v5 = vmax.f32 %v4553_v28, 0.0 }
 0x733   :  { %v4609_v18 = vmax.f32 %v4597_v60, 0.0  ;;  %v4610_v6 = vmax.f32 %v4598_v38, 0.0  ;;  %v4611_v57 = vmax.f32 %v4599_v14, 0.0  ;;  %v4543_v45 = vpop.permute.xlu1 %4542  ;;  %v4595_v47 = vpop.permute.xlu0 %4594 }
 0x734   :  { %4575 = vst [vmem:[%s7565_s4 + $0x30] sm:$0xff] %v4563_v20  ;;  %4576 = vst [vmem:[%s7565_s4 + $0x38] sm:$0xff] %v4564_v27  ;;  %v4554_v1 = vmul.f32 %v4543_v45, %v7372_v21  ;;  %v4555_v24 = vmul.f32 %v4543_v45, %v7374_v26  ;;  %v4556_v2 = vmul.f32 %v4543_v45, %v7376_v4 }
 0x735   :  { %4577 = vst.msk [vmem:[%s7565_s4 + $0x40] sm:$0xff] %vm2051_vm9, %v4565_v5  ;;  %4824 = vst [vmem:[%s7565_s4 + $0x60] sm:$0xff] %v4609_v18  ;;  %v4606_v34 = vmul.f32 %v4595_v47, %v7378_v0  ;;  %v4607_v42 = vmul.f32 %v4595_v47, %v7380_v15  ;;  %v4608_v56 = vmul.f32 %v4595_v47, %v7382_v16 }
 0x736   :  { %4825 = vst [vmem:[%s7565_s4 + $0x68] sm:$0xff] %v4610_v6  ;;  %4826 = vst.msk [vmem:[%s7565_s4 + $0x70] sm:$0xff] %vm2051_vm9, %v4611_v57  ;;  %v4566_v21 = vmax.f32 %v4554_v1, 0.0  ;;  %v4567_v30 = vmax.f32 %v4555_v24, 0.0  ;;  %v4568_v26 = vmax.f32 %v4556_v2, 0.0 }
 0x737   :  { %v4618_v32 = vmax.f32 %v4606_v34, 0.0  ;;  %v4619_v4 = vmax.f32 %v4607_v42, 0.0  ;;  %v4620_v37 = vmax.f32 %v4608_v56, 0.0 }
 0x738   :  { %4578 = vst [vmem:[%s7565_s4 + $0x48] sm:$0xff] %v4566_v21  ;;  %4579 = vst [vmem:[%s7565_s4 + $0x50] sm:$0xff] %v4567_v30  ;;  %v4587_v0 = vpop.permute.xlu1 %4586 }
 0x739   :  { %4580 = vst.msk [vmem:[%s7565_s4 + $0x58] sm:$0xff] %vm2051_vm9, %v4568_v26  ;;  %4833 = vst [vmem:[%s7565_s4 + $0xa8] sm:$0xff] %v4618_v32  ;;  %v4600_v15 = vmul.f32 %v4587_v0, %v7296_v31  ;;  %v4601_v16 = vmul.f32 %v4587_v0, %v7298_v13  ;;  %v4602_v63 = vmul.f32 %v4587_v0, %v7300_v55 }
 0x73a   :  { %4834 = vst [vmem:[%s7565_s4 + $0xb0] sm:$0xff] %v4619_v4  ;;  %4835 = vst.msk [vmem:[%s7565_s4 + $0xb8] sm:$0xff] %vm2051_vm9, %v4620_v37 }
 0x73b   :  { %v4612_v10 = vmax.f32 %v4600_v15, 0.0  ;;  %v4613_v44 = vmax.f32 %v4601_v16, 0.0  ;;  %v4614_v41 = vmax.f32 %v4602_v63, 0.0 }
 0x73c   :  { %v4591_v19 = vpop.permute.xlu1 %4590 }
 0x73d   :  { %4827 = vst [vmem:[%s7565_s4 + $0x78] sm:$0xff] %v4612_v10  ;;  %4828 = vst [vmem:[%s7565_s4 + $0x80] sm:$0xff] %v4613_v44  ;;  %v4603_v31 = vmul.f32 %v4591_v19, %v7337_v50  ;;  %v4604_v13 = vmul.f32 %v4591_v19, %v7339_v48  ;;  %v4605_v55 = vmul.f32 %v4591_v19, %v7341_v29 }
 0x73e   :  { %4829 = vst.msk [vmem:[%s7565_s4 + $0x88] sm:$0xff] %vm2051_vm9, %v4614_v41 }
 0x73f   :  { %v4615_v39 = vmax.f32 %v4603_v31, 0.0  ;;  %v4616_v12 = vmax.f32 %v4604_v13, 0.0  ;;  %v4617_v3 = vmax.f32 %v4605_v55, 0.0 }
 0x741   :  { %4830 = vst [vmem:[%s7565_s4 + $0x90] sm:$0xff] %v4615_v39  ;;  %4831 = vst [vmem:[%s7565_s4 + $0x98] sm:$0xff] %v4616_v12 }
 0x742   :  { %4832 = vst.msk [vmem:[%s7565_s4 + $0xa0] sm:$0xff] %vm2051_vm9, %v4617_v3 }

</bundles_post_ra>
